<compile_context>
chip_gen: v7x
topology: tpu7x:2x2x1
jax: 0.10.0
libtpu: 0.0.40
codegen_flags: <defaults>
</compile_context>

<pallas_src>
import math
import jax
import jax.numpy as jnp
from jax.experimental import pallas as pl
from jax.experimental.pallas import tpu as pltpu

B, S, D = 2, 8, 32          # batch, sequence, model dim
H = 4                       # attention heads
DK = D // H                 # per-head dim
DFF = 64                    # feed-forward hidden dim
N_LAYERS = 2                # Encoder depth
EPS = 1e-8                  # LayerNorm eps (matches the torch module)
BS = B * S


# ----------------------------- in-kernel helpers -----------------------------
def _layernorm(x, sigma, mu):
    # torch LayerNorm in the module: mean, *unbiased* std, eps added to std.
    mean = jnp.mean(x, axis=-1, keepdims=True)
    diff = x - mean
    var = jnp.sum(diff * diff, axis=-1, keepdims=True) * (1.0 / (x.shape[-1] - 1))
    inv = pl.reciprocal(jnp.sqrt(var) + EPS, approx=True)   # EUP slot, off the VPU path
    return sigma * diff * inv + mu


def _softmax(x):
    m = jnp.max(x, axis=-1, keepdims=True)
    e = jnp.exp(x - m)
    return e * pl.reciprocal(jnp.sum(e, axis=-1, keepdims=True), approx=True)


# --------------------------------- fused kernel -------------------------------
def encoder_kernel(x_ref, mask_ref,
                   wq_ref, bq_ref, wk_ref, bk_ref, wv_ref, bv_ref,
                   wo_ref, bo_ref, ln1s_ref, ln1m_ref,
                   w1_ref, b1_ref, w2_ref, b2_ref, ln2s_ref, ln2m_ref,
                   fsig_ref, fmu_ref, out_ref):
    layer = pl.program_id(0)
    last = N_LAYERS - 1

    # Layer 0: pull the input into the resident output block (acts as accumulator).
    @pl.when(layer == 0)
    def _():
        out_ref[...] = x_ref[...]

    x = out_ref[...]                                    # (B*S, D) f32, resident

    # Additive attention bias (== masked_fill(-1e9)), hoisted out of the head loop.
    mask = mask_ref[...]                                # (B, 1, S)
    bias = jnp.where(mask == 0.0, -1e9, 0.0)            # (B, 1, S) f32

    # ---------------- sublayer 1: x + SelfAttn(LayerNorm(x), mask) ------------
    y = _layernorm(x, ln1s_ref[0], ln1m_ref[0])
    yb = y.astype(jnp.bfloat16)                         # bf16 MXU operands, f32 accum
    scale = 1.0 / math.sqrt(DK)

    attn = jnp.zeros((BS, D), jnp.float32)
    for h in range(H):                                  # static unroll; weights pre-split per head
        qh = jnp.dot(yb, wq_ref[0, h], preferred_element_type=jnp.float32) + bq_ref[0, h]
        kh = jnp.dot(yb, wk_ref[0, h], preferred_element_type=jnp.float32) + bk_ref[0, h]
        vh = jnp.dot(yb, wv_ref[0, h], preferred_element_type=jnp.float32) + bv_ref[0, h]
        q3 = qh.reshape(B, S, DK).astype(jnp.bfloat16)  # tile-aligned leading split
        k3 = kh.reshape(B, S, DK).astype(jnp.bfloat16)
        v3 = vh.reshape(B, S, DK).astype(jnp.bfloat16)
        s3 = jnp.einsum('bqd,bkd->bqk', q3, k3,
                        preferred_element_type=jnp.float32) * scale + bias
        p = _softmax(s3)                                # (B, S, S) f32
        ctx = jnp.einsum('bqk,bkd->bqd', p.astype(jnp.bfloat16), v3,
                         preferred_element_type=jnp.float32)          # (B, S, DK)
        # fold the head-concat into a summed per-head output projection
        attn = attn + jnp.dot(ctx.reshape(BS, DK).astype(jnp.bfloat16), wo_ref[0, h],
                              preferred_element_type=jnp.float32)
    x = x + attn + bo_ref[0]

    # ---------------- sublayer 2: x + FFN(LayerNorm(x)) ------------------------
    y2 = _layernorm(x, ln2s_ref[0], ln2m_ref[0]).astype(jnp.bfloat16)
    h1 = jnp.maximum(
        jnp.dot(y2, w1_ref[0], preferred_element_type=jnp.float32) + b1_ref[0], 0.0)
    ff = jnp.dot(h1.astype(jnp.bfloat16), w2_ref[0],
                 preferred_element_type=jnp.float32) + b2_ref[0]
    x = x + ff

    # Write back resident activations; final LayerNorm fused on the last layer.
    @pl.when(layer == last)
    def _():
        out_ref[...] = _layernorm(x, fsig_ref[...], fmu_ref[...]).astype(out_ref.dtype)

    @pl.when(layer < last)
    def _():
        out_ref[...] = x.astype(out_ref.dtype)


# ------------------------------ pallas wrapper --------------------------------
def _layer_spec(arr):
    """Stacked (N_LAYERS, ...) weight: stream one layer's slice per grid step."""
    rest = arr.shape[1:]
    return pl.BlockSpec((1,) + rest, lambda l, _z=(0,) * len(rest): (l,) + _z)


def _resident_spec(arr):
    """Whole array, same block every step (kept resident in VMEM)."""
    return pl.BlockSpec(arr.shape, lambda l, _z=(0,) * arr.ndim: _z)


def encoder_forward(x, mask, p):
    x2 = x.reshape(BS, D).astype(jnp.float32)           # fold batch into rows
    stacked = (p["wq"], p["bq"], p["wk"], p["bk"], p["wv"], p["bv"],
               p["wo"], p["bo"], p["ln1s"], p["ln1m"],
               p["w1"], p["b1"], p["w2"], p["b2"], p["ln2s"], p["ln2m"])
    resident = (p["fsig"], p["fmu"])
    in_specs = ([_resident_spec(x2), _resident_spec(mask)]
                + [_layer_spec(a) for a in stacked]
                + [_resident_spec(a) for a in resident])
    out = pl.pallas_call(
        encoder_kernel,
        out_shape=jax.ShapeDtypeStruct((BS, D), jnp.float32),
        grid=(N_LAYERS,),
        in_specs=in_specs,
        out_specs=pl.BlockSpec((BS, D), lambda l: (0, 0)),   # resident accumulator
        compiler_params=pltpu.CompilerParams(
            dimension_semantics=("arbitrary",)),             # layers are sequential
    )(x2, mask, *stacked, *resident)
    return out.reshape(B, S, D)


# ----------------------------- deterministic init -----------------------------
def init_params(key):
    ks = jax.random.split(key, 6)

    def lin(k, din, dout):
        w = jax.random.normal(k, (N_LAYERS, din, dout), jnp.float32) / math.sqrt(din)
        b = jnp.zeros((N_LAYERS, 1, dout), jnp.float32)
        return w, b

    wq, bq = lin(ks[0], D, D)
    wk, bk = lin(ks[1], D, D)
    wv, bv = lin(ks[2], D, D)
    wo, bo = lin(ks[3], D, D)
    w1, b1 = lin(ks[4], D, DFF)
    w2, b2 = lin(ks[5], DFF, D)

    def heads_cols(w):       # (L, D, D) -> (L, H, D, DK): output columns per head
        return jnp.transpose(w.reshape(N_LAYERS, D, H, DK), (0, 2, 1, 3))

    def heads_cols_bias(b):  # (L, 1, D) -> (L, H, 1, DK)
        return jnp.transpose(b.reshape(N_LAYERS, 1, H, DK), (0, 2, 1, 3))

    bf16 = jnp.bfloat16
    return dict(
        wq=heads_cols(wq).astype(bf16), bq=heads_cols_bias(bq),
        wk=heads_cols(wk).astype(bf16), bk=heads_cols_bias(bk),
        wv=heads_cols(wv).astype(bf16), bv=heads_cols_bias(bv),
        wo=wo.reshape(N_LAYERS, H, DK, D).astype(bf16), bo=bo,    # rows per head
        ln1s=jnp.ones((N_LAYERS, 1, D), jnp.float32),
        ln1m=jnp.zeros((N_LAYERS, 1, D), jnp.float32),
        w1=w1.astype(bf16), b1=b1,
        w2=w2.astype(bf16), b2=b2,
        ln2s=jnp.ones((N_LAYERS, 1, D), jnp.float32),
        ln2m=jnp.zeros((N_LAYERS, 1, D), jnp.float32),
        fsig=jnp.ones((1, D), jnp.float32),
        fmu=jnp.zeros((1, D), jnp.float32),
    )


if __name__ == "__main__":
    key = jax.random.PRNGKey(0)
    kx, kp = jax.random.split(key)

    x = jax.random.normal(kx, (B, S, D), jnp.float32)
    mask = jnp.ones((B, 1, S), jnp.float32)
    mask = mask.at[1, 0, S - 2:].set(0.0)   # mask out last two positions of seq 1

    params = init_params(kp)

    # TODO(synk): dropout inside the sublayers is identity here (eval mode).
    out = encoder_forward(x, mask, params)
    jax.block_until_ready(out)
    assert out.shape == (B, S, D)
    print("KERNEL_OK")
</pallas_src>

<mosaic_0001>
module attributes {stable_mosaic.version = 11 : i64} {
  func.func @encoder_kernel(%arg0: i32, %arg1: memref<16x32xf32, #tpu.memory_space<vmem>>, %arg2: memref<2x1x8xf32, #tpu.memory_space<vmem>>, %arg3: memref<1x4x32x8xbf16, #tpu.memory_space<vmem>>, %arg4: memref<1x4x1x8xf32, #tpu.memory_space<vmem>>, %arg5: memref<1x4x32x8xbf16, #tpu.memory_space<vmem>>, %arg6: memref<1x4x1x8xf32, #tpu.memory_space<vmem>>, %arg7: memref<1x4x32x8xbf16, #tpu.memory_space<vmem>>, %arg8: memref<1x4x1x8xf32, #tpu.memory_space<vmem>>, %arg9: memref<1x4x8x32xbf16, #tpu.memory_space<vmem>>, %arg10: memref<1x1x32xf32, #tpu.memory_space<vmem>>, %arg11: memref<1x1x32xf32, #tpu.memory_space<vmem>>, %arg12: memref<1x1x32xf32, #tpu.memory_space<vmem>>, %arg13: memref<1x32x64xbf16, #tpu.memory_space<vmem>>, %arg14: memref<1x1x64xf32, #tpu.memory_space<vmem>>, %arg15: memref<1x64x32xbf16, #tpu.memory_space<vmem>>, %arg16: memref<1x1x32xf32, #tpu.memory_space<vmem>>, %arg17: memref<1x1x32xf32, #tpu.memory_space<vmem>>, %arg18: memref<1x1x32xf32, #tpu.memory_space<vmem>>, %arg19: memref<1x32xf32, #tpu.memory_space<vmem>>, %arg20: memref<1x32xf32, #tpu.memory_space<vmem>>, %arg21: memref<16x32xf32, #tpu.memory_space<vmem>>) attributes {dimension_semantics = [#tpu.dimension_semantics<arbitrary>], iteration_bounds = array<i64: 2>, scalar_prefetch = 0 : i64, scratch_operands = 0 : i64, tpu.core_type = #tpu.core_type<tc>, window_params = [{pipeline_mode = #tpu.pipeline_mode<synchronous>, transform_indices = @transform_0, window_bounds = array<i64: 16, 32>}, {pipeline_mode = #tpu.pipeline_mode<synchronous>, transform_indices = @transform_1, window_bounds = array<i64: 2, 1, 8>}, {transform_indices = @transform_2, window_bounds = array<i64: 1, 4, 32, 8>}, {transform_indices = @transform_3, window_bounds = array<i64: 1, 4, 1, 8>}, {transform_indices = @transform_4, window_bounds = array<i64: 1, 4, 32, 8>}, {transform_indices = @transform_5, window_bounds = array<i64: 1, 4, 1, 8>}, {transform_indices = @transform_6, window_bounds = array<i64: 1, 4, 32, 8>}, {transform_indices = @transform_7, window_bounds = array<i64: 1, 4, 1, 8>}, {transform_indices = @transform_8, window_bounds = array<i64: 1, 4, 8, 32>}, {transform_indices = @transform_9, window_bounds = array<i64: 1, 1, 32>}, {transform_indices = @transform_10, window_bounds = array<i64: 1, 1, 32>}, {transform_indices = @transform_11, window_bounds = array<i64: 1, 1, 32>}, {transform_indices = @transform_12, window_bounds = array<i64: 1, 32, 64>}, {transform_indices = @transform_13, window_bounds = array<i64: 1, 1, 64>}, {transform_indices = @transform_14, window_bounds = array<i64: 1, 64, 32>}, {transform_indices = @transform_15, window_bounds = array<i64: 1, 1, 32>}, {transform_indices = @transform_16, window_bounds = array<i64: 1, 1, 32>}, {transform_indices = @transform_17, window_bounds = array<i64: 1, 1, 32>}, {pipeline_mode = #tpu.pipeline_mode<synchronous>, transform_indices = @transform_18, window_bounds = array<i64: 1, 32>}, {pipeline_mode = #tpu.pipeline_mode<synchronous>, transform_indices = @transform_19, window_bounds = array<i64: 1, 32>}, {pipeline_mode = #tpu.pipeline_mode<synchronous>, transform_indices = @transform_20, window_bounds = array<i64: 16, 32>}]} {
    %c0_i32 = arith.constant 0 : i32
    %0 = arith.cmpi eq, %arg0, %c0_i32 : i32
    %1 = arith.extui %0 : i1 to i32
    %c0_i32_0 = arith.constant 0 : i32
    %2 = arith.cmpi ne, %1, %c0_i32_0 : i32
    scf.if %2 {
      %c0_196 = arith.constant 0 : index
      %c0_197 = arith.constant 0 : index
      %292 = vector.load %arg1[%c0_196, %c0_197] : memref<16x32xf32, #tpu.memory_space<vmem>>, vector<16x32xf32>
      %c0_198 = arith.constant 0 : index
      %c0_199 = arith.constant 0 : index
      %293 = vector.load %arg21[%c0_198, %c0_199] : memref<16x32xf32, #tpu.memory_space<vmem>>, vector<16x32xf32>
      tpu.vector_store %arg21[%c0_198, %c0_199], %292 {strides = array<i32>} : memref<16x32xf32, #tpu.memory_space<vmem>>, vector<16x32xf32>,
    } else {
    }
    %c0 = arith.constant 0 : index
    %c0_1 = arith.constant 0 : index
    %3 = vector.load %arg21[%c0, %c0_1] : memref<16x32xf32, #tpu.memory_space<vmem>>, vector<16x32xf32>
    %c0_2 = arith.constant 0 : index
    %c0_3 = arith.constant 0 : index
    %c0_4 = arith.constant 0 : index
    %4 = vector.load %arg2[%c0_2, %c0_3, %c0_4] : memref<2x1x8xf32, #tpu.memory_space<vmem>>, vector<2x1x8xf32>
    %cst = arith.constant 0.000000e+00 : f32
    %5 = vector.broadcast %cst : f32 to vector<2x1x8xf32>
    %6 = arith.cmpf oeq, %4, %5 : vector<2x1x8xf32>
    %cst_5 = arith.constant -1.000000e+09 : f32
    %cst_6 = arith.constant 0.000000e+00 : f32
    %7 = vector.broadcast %cst_5 : f32 to vector<2x1x8xf32>
    %8 = vector.broadcast %cst_6 : f32 to vector<2x1x8xf32>
    %9 = arith.select %6, %7, %8 : vector<2x1x8xi1>, vector<2x1x8xf32>
    %c0_7 = arith.constant 0 : index
    %c0_8 = arith.constant 0 : index
    %c0_9 = arith.constant 0 : index
    %10 = vector.load %arg11[%c0_7, %c0_8, %c0_9] : memref<1x1x32xf32, #tpu.memory_space<vmem>>, vector<1x1x32xf32>
    %11 = vector.shape_cast %10 : vector<1x1x32xf32> to vector<1x32xf32>
    %c0_10 = arith.constant 0 : index
    %c0_11 = arith.constant 0 : index
    %c0_12 = arith.constant 0 : index
    %12 = vector.load %arg12[%c0_10, %c0_11, %c0_12] : memref<1x1x32xf32, #tpu.memory_space<vmem>>, vector<1x1x32xf32>
    %13 = vector.shape_cast %12 : vector<1x1x32xf32> to vector<1x32xf32>
    %cst_13 = arith.constant dense<0.000000e+00> : vector<16xf32>
    %14 = vector.multi_reduction <add>, %3, %cst_13 [1] : vector<16x32xf32> to vector<16xf32>
    %15 = vector.shape_cast %14 : vector<16xf32> to vector<16x1xf32>
    %cst_14 = arith.constant 3.200000e+01 : f32
    %16 = vector.broadcast %cst_14 : f32 to vector<16x1xf32>
    %17 = arith.divf %15, %16 : vector<16x1xf32>
    %18 = vector.broadcast %17 : vector<16x1xf32> to vector<16x32xf32>
    %19 = arith.subf %3, %18 : vector<16x32xf32>
    %20 = arith.mulf %19, %19 : vector<16x32xf32>
    %cst_15 = arith.constant dense<0.000000e+00> : vector<16xf32>
    %21 = vector.multi_reduction <add>, %20, %cst_15 [1] : vector<16x32xf32> to vector<16xf32>
    %22 = vector.shape_cast %21 : vector<16xf32> to vector<16x1xf32>
    %cst_16 = arith.constant 0.0322580636 : f32
    %23 = vector.broadcast %cst_16 : f32 to vector<16x1xf32>
    %24 = arith.mulf %22, %23 : vector<16x1xf32>
    %25 = math.sqrt %24 : vector<16x1xf32>
    %cst_17 = arith.constant 9.99999993E-9 : f32
    %26 = vector.broadcast %cst_17 : f32 to vector<16x1xf32>
    %27 = arith.addf %25, %26 : vector<16x1xf32>
    %28 = tpu.reciprocal %27 {approx = true} : vector<16x1xf32> -> vector<16x1xf32>
    %29 = vector.broadcast %11 : vector<1x32xf32> to vector<16x32xf32>
    %30 = arith.mulf %29, %19 : vector<16x32xf32>
    %31 = vector.broadcast %28 : vector<16x1xf32> to vector<16x32xf32>
    %32 = arith.mulf %30, %31 : vector<16x32xf32>
    %33 = vector.broadcast %13 : vector<1x32xf32> to vector<16x32xf32>
    %34 = arith.addf %32, %33 : vector<16x32xf32>
    %35 = arith.truncf %34 : vector<16x32xf32> to vector<16x32xbf16>
    %cst_18 = arith.constant 0.000000e+00 : f32
    %36 = vector.broadcast %cst_18 : f32 to vector<16x32xf32>
    %c0_19 = arith.constant 0 : index
    %c0_20 = arith.constant 0 : index
    %c0_21 = arith.constant 0 : index
    %c0_22 = arith.constant 0 : index
    %37 = vector.load %arg3[%c0_19, %c0_20, %c0_21, %c0_22] : memref<1x4x32x8xbf16, #tpu.memory_space<vmem>>, vector<1x1x32x8xbf16>
    %38 = vector.shape_cast %37 : vector<1x1x32x8xbf16> to vector<32x8xbf16>
    %cst_23 = arith.constant dense<0.000000e+00> : vector<16x8xf32>
    %39 = tpu.matmul %35, %38, %cst_23 {dimension_numbers = #tpu.dot_dimension_numbers<[1], [0], [0], [1], [0, 0, 1, 1], [], []>} : vector<16x32xbf16>, vector<32x8xbf16>, vector<16x8xf32> -> vector<16x8xf32>
    %c0_24 = arith.constant 0 : index
    %c0_25 = arith.constant 0 : index
    %c0_26 = arith.constant 0 : index
    %c0_27 = arith.constant 0 : index
    %40 = vector.load %arg4[%c0_24, %c0_25, %c0_26, %c0_27] : memref<1x4x1x8xf32, #tpu.memory_space<vmem>>, vector<1x1x1x8xf32>
    %41 = vector.shape_cast %40 : vector<1x1x1x8xf32> to vector<1x8xf32>
    %42 = vector.broadcast %41 : vector<1x8xf32> to vector<16x8xf32>
    %43 = arith.addf %39, %42 : vector<16x8xf32>
    %c0_28 = arith.constant 0 : index
    %c0_29 = arith.constant 0 : index
    %c0_30 = arith.constant 0 : index
    %c0_31 = arith.constant 0 : index
    %44 = vector.load %arg5[%c0_28, %c0_29, %c0_30, %c0_31] : memref<1x4x32x8xbf16, #tpu.memory_space<vmem>>, vector<1x1x32x8xbf16>
    %45 = vector.shape_cast %44 : vector<1x1x32x8xbf16> to vector<32x8xbf16>
    %cst_32 = arith.constant dense<0.000000e+00> : vector<16x8xf32>
    %46 = tpu.matmul %35, %45, %cst_32 {dimension_numbers = #tpu.dot_dimension_numbers<[1], [0], [0], [1], [0, 0, 1, 1], [], []>} : vector<16x32xbf16>, vector<32x8xbf16>, vector<16x8xf32> -> vector<16x8xf32>
    %c0_33 = arith.constant 0 : index
    %c0_34 = arith.constant 0 : index
    %c0_35 = arith.constant 0 : index
    %c0_36 = arith.constant 0 : index
    %47 = vector.load %arg6[%c0_33, %c0_34, %c0_35, %c0_36] : memref<1x4x1x8xf32, #tpu.memory_space<vmem>>, vector<1x1x1x8xf32>
    %48 = vector.shape_cast %47 : vector<1x1x1x8xf32> to vector<1x8xf32>
    %49 = vector.broadcast %48 : vector<1x8xf32> to vector<16x8xf32>
    %50 = arith.addf %46, %49 : vector<16x8xf32>
    %c0_37 = arith.constant 0 : index
    %c0_38 = arith.constant 0 : index
    %c0_39 = arith.constant 0 : index
    %c0_40 = arith.constant 0 : index
    %51 = vector.load %arg7[%c0_37, %c0_38, %c0_39, %c0_40] : memref<1x4x32x8xbf16, #tpu.memory_space<vmem>>, vector<1x1x32x8xbf16>
    %52 = vector.shape_cast %51 : vector<1x1x32x8xbf16> to vector<32x8xbf16>
    %cst_41 = arith.constant dense<0.000000e+00> : vector<16x8xf32>
    %53 = tpu.matmul %35, %52, %cst_41 {dimension_numbers = #tpu.dot_dimension_numbers<[1], [0], [0], [1], [0, 0, 1, 1], [], []>} : vector<16x32xbf16>, vector<32x8xbf16>, vector<16x8xf32> -> vector<16x8xf32>
    %c0_42 = arith.constant 0 : index
    %c0_43 = arith.constant 0 : index
    %c0_44 = arith.constant 0 : index
    %c0_45 = arith.constant 0 : index
    %54 = vector.load %arg8[%c0_42, %c0_43, %c0_44, %c0_45] : memref<1x4x1x8xf32, #tpu.memory_space<vmem>>, vector<1x1x1x8xf32>
    %55 = vector.shape_cast %54 : vector<1x1x1x8xf32> to vector<1x8xf32>
    %56 = vector.broadcast %55 : vector<1x8xf32> to vector<16x8xf32>
    %57 = arith.addf %53, %56 : vector<16x8xf32>
    %58 = vector.shape_cast %43 : vector<16x8xf32> to vector<2x8x8xf32>
    %59 = arith.truncf %58 : vector<2x8x8xf32> to vector<2x8x8xbf16>
    %60 = vector.shape_cast %50 : vector<16x8xf32> to vector<2x8x8xf32>
    %61 = arith.truncf %60 : vector<2x8x8xf32> to vector<2x8x8xbf16>
    %62 = vector.shape_cast %57 : vector<16x8xf32> to vector<2x8x8xf32>
    %63 = arith.truncf %62 : vector<2x8x8xf32> to vector<2x8x8xbf16>
    "tpu.trace_start"() <{level = 10 : i32, message = "bqd,bkd->bqk"}> : () -> ()
    %cst_46 = arith.constant dense<0.000000e+00> : vector<2x8x8xf32>
    %64 = tpu.matmul %59, %61, %cst_46 {dimension_numbers = #tpu.dot_dimension_numbers<[2], [2], [1], [1], [0, 0, 0, 1, 1, 1], [0], [0]>} : vector<2x8x8xbf16>, vector<2x8x8xbf16>, vector<2x8x8xf32> -> vector<2x8x8xf32>
    "tpu.trace_stop"() : () -> ()
    %cst_47 = arith.constant 0.353553385 : f32
    %65 = vector.broadcast %cst_47 : f32 to vector<2x8x8xf32>
    %66 = arith.mulf %64, %65 : vector<2x8x8xf32>
    %67 = vector.broadcast %9 : vector<2x1x8xf32> to vector<2x8x8xf32>
    %68 = arith.addf %66, %67 : vector<2x8x8xf32>
    %cst_48 = arith.constant dense<0xFF800000> : vector<2x8xf32>
    %69 = vector.multi_reduction <maximumf>, %68, %cst_48 [2] : vector<2x8x8xf32> to vector<2x8xf32>
    %70 = vector.shape_cast %69 : vector<2x8xf32> to vector<2x8x1xf32>
    %71 = vector.broadcast %70 : vector<2x8x1xf32> to vector<2x8x8xf32>
    %72 = arith.subf %68, %71 : vector<2x8x8xf32>
    %73 = math.exp %72 : vector<2x8x8xf32>
    %cst_49 = arith.constant dense<0.000000e+00> : vector<2x8xf32>
    %74 = vector.multi_reduction <add>, %73, %cst_49 [2] : vector<2x8x8xf32> to vector<2x8xf32>
    %75 = vector.shape_cast %74 : vector<2x8xf32> to vector<2x8x1xf32>
    %76 = tpu.reciprocal %75 {approx = true} : vector<2x8x1xf32> -> vector<2x8x1xf32>
    %77 = vector.broadcast %76 : vector<2x8x1xf32> to vector<2x8x8xf32>
    %78 = arith.mulf %73, %77 : vector<2x8x8xf32>
    %79 = arith.truncf %78 : vector<2x8x8xf32> to vector<2x8x8xbf16>
    "tpu.trace_start"() <{level = 10 : i32, message = "bqk,bkd->bqd"}> : () -> ()
    %cst_50 = arith.constant dense<0.000000e+00> : vector<2x8x8xf32>
    %80 = tpu.matmul %79, %63, %cst_50 {dimension_numbers = #tpu.dot_dimension_numbers<[2], [1], [1], [2], [0, 0, 0, 1, 1, 2], [0], [0]>} : vector<2x8x8xbf16>, vector<2x8x8xbf16>, vector<2x8x8xf32> -> vector<2x8x8xf32>
    "tpu.trace_stop"() : () -> ()
    %81 = vector.shape_cast %80 : vector<2x8x8xf32> to vector<16x8xf32>
    %82 = arith.truncf %81 : vector<16x8xf32> to vector<16x8xbf16>
    %c0_51 = arith.constant 0 : index
    %c0_52 = arith.constant 0 : index
    %c0_53 = arith.constant 0 : index
    %c0_54 = arith.constant 0 : index
    %83 = vector.load %arg9[%c0_51, %c0_52, %c0_53, %c0_54] : memref<1x4x8x32xbf16, #tpu.memory_space<vmem>>, vector<1x1x8x32xbf16>
    %84 = vector.shape_cast %83 : vector<1x1x8x32xbf16> to vector<8x32xbf16>
    %cst_55 = arith.constant dense<0.000000e+00> : vector<16x32xf32>
    %85 = tpu.matmul %82, %84, %cst_55 {dimension_numbers = #tpu.dot_dimension_numbers<[1], [0], [0], [1], [0, 0, 1, 1], [], []>} : vector<16x8xbf16>, vector<8x32xbf16>, vector<16x32xf32> -> vector<16x32xf32>
    %86 = arith.addf %36, %85 : vector<16x32xf32>
    %c0_56 = arith.constant 0 : index
    %c1 = arith.constant 1 : index
    %c0_57 = arith.constant 0 : index
    %c0_58 = arith.constant 0 : index
    %87 = vector.load %arg3[%c0_56, %c1, %c0_57, %c0_58] : memref<1x4x32x8xbf16, #tpu.memory_space<vmem>>, vector<1x1x32x8xbf16>
    %88 = vector.shape_cast %87 : vector<1x1x32x8xbf16> to vector<32x8xbf16>
    %cst_59 = arith.constant dense<0.000000e+00> : vector<16x8xf32>
    %89 = tpu.matmul %35, %88, %cst_59 {dimension_numbers = #tpu.dot_dimension_numbers<[1], [0], [0], [1], [0, 0, 1, 1], [], []>} : vector<16x32xbf16>, vector<32x8xbf16>, vector<16x8xf32> -> vector<16x8xf32>
    %c0_60 = arith.constant 0 : index
    %c1_61 = arith.constant 1 : index
    %c0_62 = arith.constant 0 : index
    %c0_63 = arith.constant 0 : index
    %90 = vector.load %arg4[%c0_60, %c1_61, %c0_62, %c0_63] : memref<1x4x1x8xf32, #tpu.memory_space<vmem>>, vector<1x1x1x8xf32>
    %91 = vector.shape_cast %90 : vector<1x1x1x8xf32> to vector<1x8xf32>
    %92 = vector.broadcast %91 : vector<1x8xf32> to vector<16x8xf32>
    %93 = arith.addf %89, %92 : vector<16x8xf32>
    %c0_64 = arith.constant 0 : index
    %c1_65 = arith.constant 1 : index
    %c0_66 = arith.constant 0 : index
    %c0_67 = arith.constant 0 : index
    %94 = vector.load %arg5[%c0_64, %c1_65, %c0_66, %c0_67] : memref<1x4x32x8xbf16, #tpu.memory_space<vmem>>, vector<1x1x32x8xbf16>
    %95 = vector.shape_cast %94 : vector<1x1x32x8xbf16> to vector<32x8xbf16>
    %cst_68 = arith.constant dense<0.000000e+00> : vector<16x8xf32>
    %96 = tpu.matmul %35, %95, %cst_68 {dimension_numbers = #tpu.dot_dimension_numbers<[1], [0], [0], [1], [0, 0, 1, 1], [], []>} : vector<16x32xbf16>, vector<32x8xbf16>, vector<16x8xf32> -> vector<16x8xf32>
    %c0_69 = arith.constant 0 : index
    %c1_70 = arith.constant 1 : index
    %c0_71 = arith.constant 0 : index
    %c0_72 = arith.constant 0 : index
    %97 = vector.load %arg6[%c0_69, %c1_70, %c0_71, %c0_72] : memref<1x4x1x8xf32, #tpu.memory_space<vmem>>, vector<1x1x1x8xf32>
    %98 = vector.shape_cast %97 : vector<1x1x1x8xf32> to vector<1x8xf32>
    %99 = vector.broadcast %98 : vector<1x8xf32> to vector<16x8xf32>
    %100 = arith.addf %96, %99 : vector<16x8xf32>
    %c0_73 = arith.constant 0 : index
    %c1_74 = arith.constant 1 : index
    %c0_75 = arith.constant 0 : index
    %c0_76 = arith.constant 0 : index
    %101 = vector.load %arg7[%c0_73, %c1_74, %c0_75, %c0_76] : memref<1x4x32x8xbf16, #tpu.memory_space<vmem>>, vector<1x1x32x8xbf16>
    %102 = vector.shape_cast %101 : vector<1x1x32x8xbf16> to vector<32x8xbf16>
    %cst_77 = arith.constant dense<0.000000e+00> : vector<16x8xf32>
    %103 = tpu.matmul %35, %102, %cst_77 {dimension_numbers = #tpu.dot_dimension_numbers<[1], [0], [0], [1], [0, 0, 1, 1], [], []>} : vector<16x32xbf16>, vector<32x8xbf16>, vector<16x8xf32> -> vector<16x8xf32>
    %c0_78 = arith.constant 0 : index
    %c1_79 = arith.constant 1 : index
    %c0_80 = arith.constant 0 : index
    %c0_81 = arith.constant 0 : index
    %104 = vector.load %arg8[%c0_78, %c1_79, %c0_80, %c0_81] : memref<1x4x1x8xf32, #tpu.memory_space<vmem>>, vector<1x1x1x8xf32>
    %105 = vector.shape_cast %104 : vector<1x1x1x8xf32> to vector<1x8xf32>
    %106 = vector.broadcast %105 : vector<1x8xf32> to vector<16x8xf32>
    %107 = arith.addf %103, %106 : vector<16x8xf32>
    %108 = vector.shape_cast %93 : vector<16x8xf32> to vector<2x8x8xf32>
    %109 = arith.truncf %108 : vector<2x8x8xf32> to vector<2x8x8xbf16>
    %110 = vector.shape_cast %100 : vector<16x8xf32> to vector<2x8x8xf32>
    %111 = arith.truncf %110 : vector<2x8x8xf32> to vector<2x8x8xbf16>
    %112 = vector.shape_cast %107 : vector<16x8xf32> to vector<2x8x8xf32>
    %113 = arith.truncf %112 : vector<2x8x8xf32> to vector<2x8x8xbf16>
    "tpu.trace_start"() <{level = 10 : i32, message = "bqd,bkd->bqk"}> : () -> ()
    %cst_82 = arith.constant dense<0.000000e+00> : vector<2x8x8xf32>
    %114 = tpu.matmul %109, %111, %cst_82 {dimension_numbers = #tpu.dot_dimension_numbers<[2], [2], [1], [1], [0, 0, 0, 1, 1, 1], [0], [0]>} : vector<2x8x8xbf16>, vector<2x8x8xbf16>, vector<2x8x8xf32> -> vector<2x8x8xf32>
    "tpu.trace_stop"() : () -> ()
    %cst_83 = arith.constant 0.353553385 : f32
    %115 = vector.broadcast %cst_83 : f32 to vector<2x8x8xf32>
    %116 = arith.mulf %114, %115 : vector<2x8x8xf32>
    %117 = vector.broadcast %9 : vector<2x1x8xf32> to vector<2x8x8xf32>
    %118 = arith.addf %116, %117 : vector<2x8x8xf32>
    %cst_84 = arith.constant dense<0xFF800000> : vector<2x8xf32>
    %119 = vector.multi_reduction <maximumf>, %118, %cst_84 [2] : vector<2x8x8xf32> to vector<2x8xf32>
    %120 = vector.shape_cast %119 : vector<2x8xf32> to vector<2x8x1xf32>
    %121 = vector.broadcast %120 : vector<2x8x1xf32> to vector<2x8x8xf32>
    %122 = arith.subf %118, %121 : vector<2x8x8xf32>
    %123 = math.exp %122 : vector<2x8x8xf32>
    %cst_85 = arith.constant dense<0.000000e+00> : vector<2x8xf32>
    %124 = vector.multi_reduction <add>, %123, %cst_85 [2] : vector<2x8x8xf32> to vector<2x8xf32>
    %125 = vector.shape_cast %124 : vector<2x8xf32> to vector<2x8x1xf32>
    %126 = tpu.reciprocal %125 {approx = true} : vector<2x8x1xf32> -> vector<2x8x1xf32>
    %127 = vector.broadcast %126 : vector<2x8x1xf32> to vector<2x8x8xf32>
    %128 = arith.mulf %123, %127 : vector<2x8x8xf32>
    %129 = arith.truncf %128 : vector<2x8x8xf32> to vector<2x8x8xbf16>
    "tpu.trace_start"() <{level = 10 : i32, message = "bqk,bkd->bqd"}> : () -> ()
    %cst_86 = arith.constant dense<0.000000e+00> : vector<2x8x8xf32>
    %130 = tpu.matmul %129, %113, %cst_86 {dimension_numbers = #tpu.dot_dimension_numbers<[2], [1], [1], [2], [0, 0, 0, 1, 1, 2], [0], [0]>} : vector<2x8x8xbf16>, vector<2x8x8xbf16>, vector<2x8x8xf32> -> vector<2x8x8xf32>
    "tpu.trace_stop"() : () -> ()
    %131 = vector.shape_cast %130 : vector<2x8x8xf32> to vector<16x8xf32>
    %132 = arith.truncf %131 : vector<16x8xf32> to vector<16x8xbf16>
    %c0_87 = arith.constant 0 : index
    %c1_88 = arith.constant 1 : index
    %c0_89 = arith.constant 0 : index
    %c0_90 = arith.constant 0 : index
    %133 = vector.load %arg9[%c0_87, %c1_88, %c0_89, %c0_90] : memref<1x4x8x32xbf16, #tpu.memory_space<vmem>>, vector<1x1x8x32xbf16>
    %134 = vector.shape_cast %133 : vector<1x1x8x32xbf16> to vector<8x32xbf16>
    %cst_91 = arith.constant dense<0.000000e+00> : vector<16x32xf32>
    %135 = tpu.matmul %132, %134, %cst_91 {dimension_numbers = #tpu.dot_dimension_numbers<[1], [0], [0], [1], [0, 0, 1, 1], [], []>} : vector<16x8xbf16>, vector<8x32xbf16>, vector<16x32xf32> -> vector<16x32xf32>
    %136 = arith.addf %86, %135 : vector<16x32xf32>
    %c0_92 = arith.constant 0 : index
    %c2 = arith.constant 2 : index
    %c0_93 = arith.constant 0 : index
    %c0_94 = arith.constant 0 : index
    %137 = vector.load %arg3[%c0_92, %c2, %c0_93, %c0_94] : memref<1x4x32x8xbf16, #tpu.memory_space<vmem>>, vector<1x1x32x8xbf16>
    %138 = vector.shape_cast %137 : vector<1x1x32x8xbf16> to vector<32x8xbf16>
    %cst_95 = arith.constant dense<0.000000e+00> : vector<16x8xf32>
    %139 = tpu.matmul %35, %138, %cst_95 {dimension_numbers = #tpu.dot_dimension_numbers<[1], [0], [0], [1], [0, 0, 1, 1], [], []>} : vector<16x32xbf16>, vector<32x8xbf16>, vector<16x8xf32> -> vector<16x8xf32>
    %c0_96 = arith.constant 0 : index
    %c2_97 = arith.constant 2 : index
    %c0_98 = arith.constant 0 : index
    %c0_99 = arith.constant 0 : index
    %140 = vector.load %arg4[%c0_96, %c2_97, %c0_98, %c0_99] : memref<1x4x1x8xf32, #tpu.memory_space<vmem>>, vector<1x1x1x8xf32>
    %141 = vector.shape_cast %140 : vector<1x1x1x8xf32> to vector<1x8xf32>
    %142 = vector.broadcast %141 : vector<1x8xf32> to vector<16x8xf32>
    %143 = arith.addf %139, %142 : vector<16x8xf32>
    %c0_100 = arith.constant 0 : index
    %c2_101 = arith.constant 2 : index
    %c0_102 = arith.constant 0 : index
    %c0_103 = arith.constant 0 : index
    %144 = vector.load %arg5[%c0_100, %c2_101, %c0_102, %c0_103] : memref<1x4x32x8xbf16, #tpu.memory_space<vmem>>, vector<1x1x32x8xbf16>
    %145 = vector.shape_cast %144 : vector<1x1x32x8xbf16> to vector<32x8xbf16>
    %cst_104 = arith.constant dense<0.000000e+00> : vector<16x8xf32>
    %146 = tpu.matmul %35, %145, %cst_104 {dimension_numbers = #tpu.dot_dimension_numbers<[1], [0], [0], [1], [0, 0, 1, 1], [], []>} : vector<16x32xbf16>, vector<32x8xbf16>, vector<16x8xf32> -> vector<16x8xf32>
    %c0_105 = arith.constant 0 : index
    %c2_106 = arith.constant 2 : index
    %c0_107 = arith.constant 0 : index
    %c0_108 = arith.constant 0 : index
    %147 = vector.load %arg6[%c0_105, %c2_106, %c0_107, %c0_108] : memref<1x4x1x8xf32, #tpu.memory_space<vmem>>, vector<1x1x1x8xf32>
    %148 = vector.shape_cast %147 : vector<1x1x1x8xf32> to vector<1x8xf32>
    %149 = vector.broadcast %148 : vector<1x8xf32> to vector<16x8xf32>
    %150 = arith.addf %146, %149 : vector<16x8xf32>
    %c0_109 = arith.constant 0 : index
    %c2_110 = arith.constant 2 : index
    %c0_111 = arith.constant 0 : index
    %c0_112 = arith.constant 0 : index
    %151 = vector.load %arg7[%c0_109, %c2_110, %c0_111, %c0_112] : memref<1x4x32x8xbf16, #tpu.memory_space<vmem>>, vector<1x1x32x8xbf16>
    %152 = vector.shape_cast %151 : vector<1x1x32x8xbf16> to vector<32x8xbf16>
    %cst_113 = arith.constant dense<0.000000e+00> : vector<16x8xf32>
    %153 = tpu.matmul %35, %152, %cst_113 {dimension_numbers = #tpu.dot_dimension_numbers<[1], [0], [0], [1], [0, 0, 1, 1], [], []>} : vector<16x32xbf16>, vector<32x8xbf16>, vector<16x8xf32> -> vector<16x8xf32>
    %c0_114 = arith.constant 0 : index
    %c2_115 = arith.constant 2 : index
    %c0_116 = arith.constant 0 : index
    %c0_117 = arith.constant 0 : index
    %154 = vector.load %arg8[%c0_114, %c2_115, %c0_116, %c0_117] : memref<1x4x1x8xf32, #tpu.memory_space<vmem>>, vector<1x1x1x8xf32>
    %155 = vector.shape_cast %154 : vector<1x1x1x8xf32> to vector<1x8xf32>
    %156 = vector.broadcast %155 : vector<1x8xf32> to vector<16x8xf32>
    %157 = arith.addf %153, %156 : vector<16x8xf32>
    %158 = vector.shape_cast %143 : vector<16x8xf32> to vector<2x8x8xf32>
    %159 = arith.truncf %158 : vector<2x8x8xf32> to vector<2x8x8xbf16>
    %160 = vector.shape_cast %150 : vector<16x8xf32> to vector<2x8x8xf32>
    %161 = arith.truncf %160 : vector<2x8x8xf32> to vector<2x8x8xbf16>
    %162 = vector.shape_cast %157 : vector<16x8xf32> to vector<2x8x8xf32>
    %163 = arith.truncf %162 : vector<2x8x8xf32> to vector<2x8x8xbf16>
    "tpu.trace_start"() <{level = 10 : i32, message = "bqd,bkd->bqk"}> : () -> ()
    %cst_118 = arith.constant dense<0.000000e+00> : vector<2x8x8xf32>
    %164 = tpu.matmul %159, %161, %cst_118 {dimension_numbers = #tpu.dot_dimension_numbers<[2], [2], [1], [1], [0, 0, 0, 1, 1, 1], [0], [0]>} : vector<2x8x8xbf16>, vector<2x8x8xbf16>, vector<2x8x8xf32> -> vector<2x8x8xf32>
    "tpu.trace_stop"() : () -> ()
    %cst_119 = arith.constant 0.353553385 : f32
    %165 = vector.broadcast %cst_119 : f32 to vector<2x8x8xf32>
    %166 = arith.mulf %164, %165 : vector<2x8x8xf32>
    %167 = vector.broadcast %9 : vector<2x1x8xf32> to vector<2x8x8xf32>
    %168 = arith.addf %166, %167 : vector<2x8x8xf32>
    %cst_120 = arith.constant dense<0xFF800000> : vector<2x8xf32>
    %169 = vector.multi_reduction <maximumf>, %168, %cst_120 [2] : vector<2x8x8xf32> to vector<2x8xf32>
    %170 = vector.shape_cast %169 : vector<2x8xf32> to vector<2x8x1xf32>
    %171 = vector.broadcast %170 : vector<2x8x1xf32> to vector<2x8x8xf32>
    %172 = arith.subf %168, %171 : vector<2x8x8xf32>
    %173 = math.exp %172 : vector<2x8x8xf32>
    %cst_121 = arith.constant dense<0.000000e+00> : vector<2x8xf32>
    %174 = vector.multi_reduction <add>, %173, %cst_121 [2] : vector<2x8x8xf32> to vector<2x8xf32>
    %175 = vector.shape_cast %174 : vector<2x8xf32> to vector<2x8x1xf32>
    %176 = tpu.reciprocal %175 {approx = true} : vector<2x8x1xf32> -> vector<2x8x1xf32>
    %177 = vector.broadcast %176 : vector<2x8x1xf32> to vector<2x8x8xf32>
    %178 = arith.mulf %173, %177 : vector<2x8x8xf32>
    %179 = arith.truncf %178 : vector<2x8x8xf32> to vector<2x8x8xbf16>
    "tpu.trace_start"() <{level = 10 : i32, message = "bqk,bkd->bqd"}> : () -> ()
    %cst_122 = arith.constant dense<0.000000e+00> : vector<2x8x8xf32>
    %180 = tpu.matmul %179, %163, %cst_122 {dimension_numbers = #tpu.dot_dimension_numbers<[2], [1], [1], [2], [0, 0, 0, 1, 1, 2], [0], [0]>} : vector<2x8x8xbf16>, vector<2x8x8xbf16>, vector<2x8x8xf32> -> vector<2x8x8xf32>
    "tpu.trace_stop"() : () -> ()
    %181 = vector.shape_cast %180 : vector<2x8x8xf32> to vector<16x8xf32>
    %182 = arith.truncf %181 : vector<16x8xf32> to vector<16x8xbf16>
    %c0_123 = arith.constant 0 : index
    %c2_124 = arith.constant 2 : index
    %c0_125 = arith.constant 0 : index
    %c0_126 = arith.constant 0 : index
    %183 = vector.load %arg9[%c0_123, %c2_124, %c0_125, %c0_126] : memref<1x4x8x32xbf16, #tpu.memory_space<vmem>>, vector<1x1x8x32xbf16>
    %184 = vector.shape_cast %183 : vector<1x1x8x32xbf16> to vector<8x32xbf16>
    %cst_127 = arith.constant dense<0.000000e+00> : vector<16x32xf32>
    %185 = tpu.matmul %182, %184, %cst_127 {dimension_numbers = #tpu.dot_dimension_numbers<[1], [0], [0], [1], [0, 0, 1, 1], [], []>} : vector<16x8xbf16>, vector<8x32xbf16>, vector<16x32xf32> -> vector<16x32xf32>
    %186 = arith.addf %136, %185 : vector<16x32xf32>
    %c0_128 = arith.constant 0 : index
    %c3 = arith.constant 3 : index
    %c0_129 = arith.constant 0 : index
    %c0_130 = arith.constant 0 : index
    %187 = vector.load %arg3[%c0_128, %c3, %c0_129, %c0_130] : memref<1x4x32x8xbf16, #tpu.memory_space<vmem>>, vector<1x1x32x8xbf16>
    %188 = vector.shape_cast %187 : vector<1x1x32x8xbf16> to vector<32x8xbf16>
    %cst_131 = arith.constant dense<0.000000e+00> : vector<16x8xf32>
    %189 = tpu.matmul %35, %188, %cst_131 {dimension_numbers = #tpu.dot_dimension_numbers<[1], [0], [0], [1], [0, 0, 1, 1], [], []>} : vector<16x32xbf16>, vector<32x8xbf16>, vector<16x8xf32> -> vector<16x8xf32>
    %c0_132 = arith.constant 0 : index
    %c3_133 = arith.constant 3 : index
    %c0_134 = arith.constant 0 : index
    %c0_135 = arith.constant 0 : index
    %190 = vector.load %arg4[%c0_132, %c3_133, %c0_134, %c0_135] : memref<1x4x1x8xf32, #tpu.memory_space<vmem>>, vector<1x1x1x8xf32>
    %191 = vector.shape_cast %190 : vector<1x1x1x8xf32> to vector<1x8xf32>
    %192 = vector.broadcast %191 : vector<1x8xf32> to vector<16x8xf32>
    %193 = arith.addf %189, %192 : vector<16x8xf32>
    %c0_136 = arith.constant 0 : index
    %c3_137 = arith.constant 3 : index
    %c0_138 = arith.constant 0 : index
    %c0_139 = arith.constant 0 : index
    %194 = vector.load %arg5[%c0_136, %c3_137, %c0_138, %c0_139] : memref<1x4x32x8xbf16, #tpu.memory_space<vmem>>, vector<1x1x32x8xbf16>
    %195 = vector.shape_cast %194 : vector<1x1x32x8xbf16> to vector<32x8xbf16>
    %cst_140 = arith.constant dense<0.000000e+00> : vector<16x8xf32>
    %196 = tpu.matmul %35, %195, %cst_140 {dimension_numbers = #tpu.dot_dimension_numbers<[1], [0], [0], [1], [0, 0, 1, 1], [], []>} : vector<16x32xbf16>, vector<32x8xbf16>, vector<16x8xf32> -> vector<16x8xf32>
    %c0_141 = arith.constant 0 : index
    %c3_142 = arith.constant 3 : index
    %c0_143 = arith.constant 0 : index
    %c0_144 = arith.constant 0 : index
    %197 = vector.load %arg6[%c0_141, %c3_142, %c0_143, %c0_144] : memref<1x4x1x8xf32, #tpu.memory_space<vmem>>, vector<1x1x1x8xf32>
    %198 = vector.shape_cast %197 : vector<1x1x1x8xf32> to vector<1x8xf32>
    %199 = vector.broadcast %198 : vector<1x8xf32> to vector<16x8xf32>
    %200 = arith.addf %196, %199 : vector<16x8xf32>
    %c0_145 = arith.constant 0 : index
    %c3_146 = arith.constant 3 : index
    %c0_147 = arith.constant 0 : index
    %c0_148 = arith.constant 0 : index
    %201 = vector.load %arg7[%c0_145, %c3_146, %c0_147, %c0_148] : memref<1x4x32x8xbf16, #tpu.memory_space<vmem>>, vector<1x1x32x8xbf16>
    %202 = vector.shape_cast %201 : vector<1x1x32x8xbf16> to vector<32x8xbf16>
    %cst_149 = arith.constant dense<0.000000e+00> : vector<16x8xf32>
    %203 = tpu.matmul %35, %202, %cst_149 {dimension_numbers = #tpu.dot_dimension_numbers<[1], [0], [0], [1], [0, 0, 1, 1], [], []>} : vector<16x32xbf16>, vector<32x8xbf16>, vector<16x8xf32> -> vector<16x8xf32>
    %c0_150 = arith.constant 0 : index
    %c3_151 = arith.constant 3 : index
    %c0_152 = arith.constant 0 : index
    %c0_153 = arith.constant 0 : index
    %204 = vector.load %arg8[%c0_150, %c3_151, %c0_152, %c0_153] : memref<1x4x1x8xf32, #tpu.memory_space<vmem>>, vector<1x1x1x8xf32>
    %205 = vector.shape_cast %204 : vector<1x1x1x8xf32> to vector<1x8xf32>
    %206 = vector.broadcast %205 : vector<1x8xf32> to vector<16x8xf32>
    %207 = arith.addf %203, %206 : vector<16x8xf32>
    %208 = vector.shape_cast %193 : vector<16x8xf32> to vector<2x8x8xf32>
    %209 = arith.truncf %208 : vector<2x8x8xf32> to vector<2x8x8xbf16>
    %210 = vector.shape_cast %200 : vector<16x8xf32> to vector<2x8x8xf32>
    %211 = arith.truncf %210 : vector<2x8x8xf32> to vector<2x8x8xbf16>
    %212 = vector.shape_cast %207 : vector<16x8xf32> to vector<2x8x8xf32>
    %213 = arith.truncf %212 : vector<2x8x8xf32> to vector<2x8x8xbf16>
    "tpu.trace_start"() <{level = 10 : i32, message = "bqd,bkd->bqk"}> : () -> ()
    %cst_154 = arith.constant dense<0.000000e+00> : vector<2x8x8xf32>
    %214 = tpu.matmul %209, %211, %cst_154 {dimension_numbers = #tpu.dot_dimension_numbers<[2], [2], [1], [1], [0, 0, 0, 1, 1, 1], [0], [0]>} : vector<2x8x8xbf16>, vector<2x8x8xbf16>, vector<2x8x8xf32> -> vector<2x8x8xf32>
    "tpu.trace_stop"() : () -> ()
    %cst_155 = arith.constant 0.353553385 : f32
    %215 = vector.broadcast %cst_155 : f32 to vector<2x8x8xf32>
    %216 = arith.mulf %214, %215 : vector<2x8x8xf32>
    %217 = vector.broadcast %9 : vector<2x1x8xf32> to vector<2x8x8xf32>
    %218 = arith.addf %216, %217 : vector<2x8x8xf32>
    %cst_156 = arith.constant dense<0xFF800000> : vector<2x8xf32>
    %219 = vector.multi_reduction <maximumf>, %218, %cst_156 [2] : vector<2x8x8xf32> to vector<2x8xf32>
    %220 = vector.shape_cast %219 : vector<2x8xf32> to vector<2x8x1xf32>
    %221 = vector.broadcast %220 : vector<2x8x1xf32> to vector<2x8x8xf32>
    %222 = arith.subf %218, %221 : vector<2x8x8xf32>
    %223 = math.exp %222 : vector<2x8x8xf32>
    %cst_157 = arith.constant dense<0.000000e+00> : vector<2x8xf32>
    %224 = vector.multi_reduction <add>, %223, %cst_157 [2] : vector<2x8x8xf32> to vector<2x8xf32>
    %225 = vector.shape_cast %224 : vector<2x8xf32> to vector<2x8x1xf32>
    %226 = tpu.reciprocal %225 {approx = true} : vector<2x8x1xf32> -> vector<2x8x1xf32>
    %227 = vector.broadcast %226 : vector<2x8x1xf32> to vector<2x8x8xf32>
    %228 = arith.mulf %223, %227 : vector<2x8x8xf32>
    %229 = arith.truncf %228 : vector<2x8x8xf32> to vector<2x8x8xbf16>
    "tpu.trace_start"() <{level = 10 : i32, message = "bqk,bkd->bqd"}> : () -> ()
    %cst_158 = arith.constant dense<0.000000e+00> : vector<2x8x8xf32>
    %230 = tpu.matmul %229, %213, %cst_158 {dimension_numbers = #tpu.dot_dimension_numbers<[2], [1], [1], [2], [0, 0, 0, 1, 1, 2], [0], [0]>} : vector<2x8x8xbf16>, vector<2x8x8xbf16>, vector<2x8x8xf32> -> vector<2x8x8xf32>
    "tpu.trace_stop"() : () -> ()
    %231 = vector.shape_cast %230 : vector<2x8x8xf32> to vector<16x8xf32>
    %232 = arith.truncf %231 : vector<16x8xf32> to vector<16x8xbf16>
    %c0_159 = arith.constant 0 : index
    %c3_160 = arith.constant 3 : index
    %c0_161 = arith.constant 0 : index
    %c0_162 = arith.constant 0 : index
    %233 = vector.load %arg9[%c0_159, %c3_160, %c0_161, %c0_162] : memref<1x4x8x32xbf16, #tpu.memory_space<vmem>>, vector<1x1x8x32xbf16>
    %234 = vector.shape_cast %233 : vector<1x1x8x32xbf16> to vector<8x32xbf16>
    %cst_163 = arith.constant dense<0.000000e+00> : vector<16x32xf32>
    %235 = tpu.matmul %232, %234, %cst_163 {dimension_numbers = #tpu.dot_dimension_numbers<[1], [0], [0], [1], [0, 0, 1, 1], [], []>} : vector<16x8xbf16>, vector<8x32xbf16>, vector<16x32xf32> -> vector<16x32xf32>
    %236 = arith.addf %186, %235 : vector<16x32xf32>
    %237 = arith.addf %3, %236 : vector<16x32xf32>
    %c0_164 = arith.constant 0 : index
    %c0_165 = arith.constant 0 : index
    %c0_166 = arith.constant 0 : index
    %238 = vector.load %arg10[%c0_164, %c0_165, %c0_166] : memref<1x1x32xf32, #tpu.memory_space<vmem>>, vector<1x1x32xf32>
    %239 = vector.shape_cast %238 : vector<1x1x32xf32> to vector<1x32xf32>
    %240 = vector.broadcast %239 : vector<1x32xf32> to vector<16x32xf32>
    %241 = arith.addf %237, %240 : vector<16x32xf32>
    %c0_167 = arith.constant 0 : index
    %c0_168 = arith.constant 0 : index
    %c0_169 = arith.constant 0 : index
    %242 = vector.load %arg17[%c0_167, %c0_168, %c0_169] : memref<1x1x32xf32, #tpu.memory_space<vmem>>, vector<1x1x32xf32>
    %243 = vector.shape_cast %242 : vector<1x1x32xf32> to vector<1x32xf32>
    %c0_170 = arith.constant 0 : index
    %c0_171 = arith.constant 0 : index
    %c0_172 = arith.constant 0 : index
    %244 = vector.load %arg18[%c0_170, %c0_171, %c0_172] : memref<1x1x32xf32, #tpu.memory_space<vmem>>, vector<1x1x32xf32>
    %245 = vector.shape_cast %244 : vector<1x1x32xf32> to vector<1x32xf32>
    %cst_173 = arith.constant dense<0.000000e+00> : vector<16xf32>
    %246 = vector.multi_reduction <add>, %241, %cst_173 [1] : vector<16x32xf32> to vector<16xf32>
    %247 = vector.shape_cast %246 : vector<16xf32> to vector<16x1xf32>
    %cst_174 = arith.constant 3.200000e+01 : f32
    %248 = vector.broadcast %cst_174 : f32 to vector<16x1xf32>
    %249 = arith.divf %247, %248 : vector<16x1xf32>
    %250 = vector.broadcast %249 : vector<16x1xf32> to vector<16x32xf32>
    %251 = arith.subf %241, %250 : vector<16x32xf32>
    %252 = arith.mulf %251, %251 : vector<16x32xf32>
    %cst_175 = arith.constant dense<0.000000e+00> : vector<16xf32>
    %253 = vector.multi_reduction <add>, %252, %cst_175 [1] : vector<16x32xf32> to vector<16xf32>
    %254 = vector.shape_cast %253 : vector<16xf32> to vector<16x1xf32>
    %cst_176 = arith.constant 0.0322580636 : f32
    %255 = vector.broadcast %cst_176 : f32 to vector<16x1xf32>
    %256 = arith.mulf %254, %255 : vector<16x1xf32>
    %257 = math.sqrt %256 : vector<16x1xf32>
    %cst_177 = arith.constant 9.99999993E-9 : f32
    %258 = vector.broadcast %cst_177 : f32 to vector<16x1xf32>
    %259 = arith.addf %257, %258 : vector<16x1xf32>
    %260 = tpu.reciprocal %259 {approx = true} : vector<16x1xf32> -> vector<16x1xf32>
    %261 = vector.broadcast %243 : vector<1x32xf32> to vector<16x32xf32>
    %262 = arith.mulf %261, %251 : vector<16x32xf32>
    %263 = vector.broadcast %260 : vector<16x1xf32> to vector<16x32xf32>
    %264 = arith.mulf %262, %263 : vector<16x32xf32>
    %265 = vector.broadcast %245 : vector<1x32xf32> to vector<16x32xf32>
    %266 = arith.addf %264, %265 : vector<16x32xf32>
    %267 = arith.truncf %266 : vector<16x32xf32> to vector<16x32xbf16>
    %c0_178 = arith.constant 0 : index
    %c0_179 = arith.constant 0 : index
    %c0_180 = arith.constant 0 : index
    %268 = vector.load %arg13[%c0_178, %c0_179, %c0_180] : memref<1x32x64xbf16, #tpu.memory_space<vmem>>, vector<1x32x64xbf16>
    %269 = vector.shape_cast %268 : vector<1x32x64xbf16> to vector<32x64xbf16>
    %cst_181 = arith.constant dense<0.000000e+00> : vector<16x64xf32>
    %270 = tpu.matmul %267, %269, %cst_181 {dimension_numbers = #tpu.dot_dimension_numbers<[1], [0], [0], [1], [0, 0, 1, 1], [], []>} : vector<16x32xbf16>, vector<32x64xbf16>, vector<16x64xf32> -> vector<16x64xf32>
    %c0_182 = arith.constant 0 : index
    %c0_183 = arith.constant 0 : index
    %c0_184 = arith.constant 0 : index
    %271 = vector.load %arg14[%c0_182, %c0_183, %c0_184] : memref<1x1x64xf32, #tpu.memory_space<vmem>>, vector<1x1x64xf32>
    %272 = vector.shape_cast %271 : vector<1x1x64xf32> to vector<1x64xf32>
    %273 = vector.broadcast %272 : vector<1x64xf32> to vector<16x64xf32>
    %274 = arith.addf %270, %273 : vector<16x64xf32>
    %cst_185 = arith.constant 0.000000e+00 : f32
    %275 = vector.broadcast %cst_185 : f32 to vector<16x64xf32>
    %276 = arith.maximumf %274, %275 : vector<16x64xf32>
    %277 = arith.truncf %276 : vector<16x64xf32> to vector<16x64xbf16>
    %c0_186 = arith.constant 0 : index
    %c0_187 = arith.constant 0 : index
    %c0_188 = arith.constant 0 : index
    %278 = vector.load %arg15[%c0_186, %c0_187, %c0_188] : memref<1x64x32xbf16, #tpu.memory_space<vmem>>, vector<1x64x32xbf16>
    %279 = vector.shape_cast %278 : vector<1x64x32xbf16> to vector<64x32xbf16>
    %cst_189 = arith.constant dense<0.000000e+00> : vector<16x32xf32>
    %280 = tpu.matmul %277, %279, %cst_189 {dimension_numbers = #tpu.dot_dimension_numbers<[1], [0], [0], [1], [0, 0, 1, 1], [], []>} : vector<16x64xbf16>, vector<64x32xbf16>, vector<16x32xf32> -> vector<16x32xf32>
    %c0_190 = arith.constant 0 : index
    %c0_191 = arith.constant 0 : index
    %c0_192 = arith.constant 0 : index
    %281 = vector.load %arg16[%c0_190, %c0_191, %c0_192] : memref<1x1x32xf32, #tpu.memory_space<vmem>>, vector<1x1x32xf32>
    %282 = vector.shape_cast %281 : vector<1x1x32xf32> to vector<1x32xf32>
    %283 = vector.broadcast %282 : vector<1x32xf32> to vector<16x32xf32>
    %284 = arith.addf %280, %283 : vector<16x32xf32>
    %285 = arith.addf %241, %284 : vector<16x32xf32>
    %c1_i32 = arith.constant 1 : i32
    %286 = arith.cmpi eq, %arg0, %c1_i32 : i32
    %287 = arith.extui %286 : i1 to i32
    %c0_i32_193 = arith.constant 0 : i32
    %288 = arith.cmpi ne, %287, %c0_i32_193 : i32
    scf.if %288 {
      %c0_196 = arith.constant 0 : index
      %c0_197 = arith.constant 0 : index
      %292 = vector.load %arg19[%c0_196, %c0_197] : memref<1x32xf32, #tpu.memory_space<vmem>>, vector<1x32xf32>
      %c0_198 = arith.constant 0 : index
      %c0_199 = arith.constant 0 : index
      %293 = vector.load %arg20[%c0_198, %c0_199] : memref<1x32xf32, #tpu.memory_space<vmem>>, vector<1x32xf32>
      %cst_200 = arith.constant dense<0.000000e+00> : vector<16xf32>
      %294 = vector.multi_reduction <add>, %285, %cst_200 [1] : vector<16x32xf32> to vector<16xf32>
      %295 = vector.shape_cast %294 : vector<16xf32> to vector<16x1xf32>
      %cst_201 = arith.constant 3.200000e+01 : f32
      %296 = vector.broadcast %cst_201 : f32 to vector<16x1xf32>
      %297 = arith.divf %295, %296 : vector<16x1xf32>
      %298 = vector.broadcast %297 : vector<16x1xf32> to vector<16x32xf32>
      %299 = arith.subf %285, %298 : vector<16x32xf32>
      %300 = arith.mulf %299, %299 : vector<16x32xf32>
      %cst_202 = arith.constant dense<0.000000e+00> : vector<16xf32>
      %301 = vector.multi_reduction <add>, %300, %cst_202 [1] : vector<16x32xf32> to vector<16xf32>
      %302 = vector.shape_cast %301 : vector<16xf32> to vector<16x1xf32>
      %cst_203 = arith.constant 0.0322580636 : f32
      %303 = vector.broadcast %cst_203 : f32 to vector<16x1xf32>
      %304 = arith.mulf %302, %303 : vector<16x1xf32>
      %305 = math.sqrt %304 : vector<16x1xf32>
      %cst_204 = arith.constant 9.99999993E-9 : f32
      %306 = vector.broadcast %cst_204 : f32 to vector<16x1xf32>
      %307 = arith.addf %305, %306 : vector<16x1xf32>
      %308 = tpu.reciprocal %307 {approx = true} : vector<16x1xf32> -> vector<16x1xf32>
      %309 = vector.broadcast %292 : vector<1x32xf32> to vector<16x32xf32>
      %310 = arith.mulf %309, %299 : vector<16x32xf32>
      %311 = vector.broadcast %308 : vector<16x1xf32> to vector<16x32xf32>
      %312 = arith.mulf %310, %311 : vector<16x32xf32>
      %313 = vector.broadcast %293 : vector<1x32xf32> to vector<16x32xf32>
      %314 = arith.addf %312, %313 : vector<16x32xf32>
      %c0_205 = arith.constant 0 : index
      %c0_206 = arith.constant 0 : index
      %315 = vector.load %arg21[%c0_205, %c0_206] : memref<16x32xf32, #tpu.memory_space<vmem>>, vector<16x32xf32>
      tpu.vector_store %arg21[%c0_205, %c0_206], %314 {strides = array<i32>} : memref<16x32xf32, #tpu.memory_space<vmem>>, vector<16x32xf32>,
    } else {
    }
    %c1_i32_194 = arith.constant 1 : i32
    %289 = arith.cmpi slt, %arg0, %c1_i32_194 : i32
    %290 = arith.extui %289 : i1 to i32
    %c0_i32_195 = arith.constant 0 : i32
    %291 = arith.cmpi ne, %290, %c0_i32_195 : i32
    scf.if %291 {
      %c0_196 = arith.constant 0 : index
      %c0_197 = arith.constant 0 : index
      %292 = vector.load %arg21[%c0_196, %c0_197] : memref<16x32xf32, #tpu.memory_space<vmem>>, vector<16x32xf32>
      tpu.vector_store %arg21[%c0_196, %c0_197], %285 {strides = array<i32>} : memref<16x32xf32, #tpu.memory_space<vmem>>, vector<16x32xf32>,
    } else {
    }
    return
  }
  func.func @transform_0(%arg0: i32) -> (i32, i32) {
    %c0_i32 = arith.constant 0 : i32
    %c0_i32_0 = arith.constant 0 : i32
    %c0_i32_1 = arith.constant 0 : i32
    return %c0_i32, %c0_i32_0 : i32, i32
  }
  func.func @transform_1(%arg0: i32) -> (i32, i32, i32) {
    %c0_i32 = arith.constant 0 : i32
    %c0_i32_0 = arith.constant 0 : i32
    %c0_i32_1 = arith.constant 0 : i32
    %c0_i32_2 = arith.constant 0 : i32
    return %c0_i32, %c0_i32_0, %c0_i32_1 : i32, i32, i32
  }
  func.func @transform_2(%arg0: i32) -> (i32, i32, i32, i32) {
    %c0_i32 = arith.constant 0 : i32
    %c0_i32_0 = arith.constant 0 : i32
    %c0_i32_1 = arith.constant 0 : i32
    %c0_i32_2 = arith.constant 0 : i32
    return %arg0, %c0_i32, %c0_i32_0, %c0_i32_1 : i32, i32, i32, i32
  }
  func.func @transform_3(%arg0: i32) -> (i32, i32, i32, i32) {
    %c0_i32 = arith.constant 0 : i32
    %c0_i32_0 = arith.constant 0 : i32
    %c0_i32_1 = arith.constant 0 : i32
    %c0_i32_2 = arith.constant 0 : i32
    return %arg0, %c0_i32, %c0_i32_0, %c0_i32_1 : i32, i32, i32, i32
  }
  func.func @transform_4(%arg0: i32) -> (i32, i32, i32, i32) {
    %c0_i32 = arith.constant 0 : i32
    %c0_i32_0 = arith.constant 0 : i32
    %c0_i32_1 = arith.constant 0 : i32
    %c0_i32_2 = arith.constant 0 : i32
    return %arg0, %c0_i32, %c0_i32_0, %c0_i32_1 : i32, i32, i32, i32
  }
  func.func @transform_5(%arg0: i32) -> (i32, i32, i32, i32) {
    %c0_i32 = arith.constant 0 : i32
    %c0_i32_0 = arith.constant 0 : i32
    %c0_i32_1 = arith.constant 0 : i32
    %c0_i32_2 = arith.constant 0 : i32
    return %arg0, %c0_i32, %c0_i32_0, %c0_i32_1 : i32, i32, i32, i32
  }
  func.func @transform_6(%arg0: i32) -> (i32, i32, i32, i32) {
    %c0_i32 = arith.constant 0 : i32
    %c0_i32_0 = arith.constant 0 : i32
    %c0_i32_1 = arith.constant 0 : i32
    %c0_i32_2 = arith.constant 0 : i32
    return %arg0, %c0_i32, %c0_i32_0, %c0_i32_1 : i32, i32, i32, i32
  }
  func.func @transform_7(%arg0: i32) -> (i32, i32, i32, i32) {
    %c0_i32 = arith.constant 0 : i32
    %c0_i32_0 = arith.constant 0 : i32
    %c0_i32_1 = arith.constant 0 : i32
    %c0_i32_2 = arith.constant 0 : i32
    return %arg0, %c0_i32, %c0_i32_0, %c0_i32_1 : i32, i32, i32, i32
  }
  func.func @transform_8(%arg0: i32) -> (i32, i32, i32, i32) {
    %c0_i32 = arith.constant 0 : i32
    %c0_i32_0 = arith.constant 0 : i32
    %c0_i32_1 = arith.constant 0 : i32
    %c0_i32_2 = arith.constant 0 : i32
    return %arg0, %c0_i32, %c0_i32_0, %c0_i32_1 : i32, i32, i32, i32
  }
  func.func @transform_9(%arg0: i32) -> (i32, i32, i32) {
    %c0_i32 = arith.constant 0 : i32
    %c0_i32_0 = arith.constant 0 : i32
    %c0_i32_1 = arith.constant 0 : i32
    return %arg0, %c0_i32, %c0_i32_0 : i32, i32, i32
  }
  func.func @transform_10(%arg0: i32) -> (i32, i32, i32) {
    %c0_i32 = arith.constant 0 : i32
    %c0_i32_0 = arith.constant 0 : i32
    %c0_i32_1 = arith.constant 0 : i32
    return %arg0, %c0_i32, %c0_i32_0 : i32, i32, i32
  }
  func.func @transform_11(%arg0: i32) -> (i32, i32, i32) {
    %c0_i32 = arith.constant 0 : i32
    %c0_i32_0 = arith.constant 0 : i32
    %c0_i32_1 = arith.constant 0 : i32
    return %arg0, %c0_i32, %c0_i32_0 : i32, i32, i32
  }
  func.func @transform_12(%arg0: i32) -> (i32, i32, i32) {
    %c0_i32 = arith.constant 0 : i32
    %c0_i32_0 = arith.constant 0 : i32
    %c0_i32_1 = arith.constant 0 : i32
    return %arg0, %c0_i32, %c0_i32_0 : i32, i32, i32
  }
  func.func @transform_13(%arg0: i32) -> (i32, i32, i32) {
    %c0_i32 = arith.constant 0 : i32
    %c0_i32_0 = arith.constant 0 : i32
    %c0_i32_1 = arith.constant 0 : i32
    return %arg0, %c0_i32, %c0_i32_0 : i32, i32, i32
  }
  func.func @transform_14(%arg0: i32) -> (i32, i32, i32) {
    %c0_i32 = arith.constant 0 : i32
    %c0_i32_0 = arith.constant 0 : i32
    %c0_i32_1 = arith.constant 0 : i32
    return %arg0, %c0_i32, %c0_i32_0 : i32, i32, i32
  }
  func.func @transform_15(%arg0: i32) -> (i32, i32, i32) {
    %c0_i32 = arith.constant 0 : i32
    %c0_i32_0 = arith.constant 0 : i32
    %c0_i32_1 = arith.constant 0 : i32
    return %arg0, %c0_i32, %c0_i32_0 : i32, i32, i32
  }
  func.func @transform_16(%arg0: i32) -> (i32, i32, i32) {
    %c0_i32 = arith.constant 0 : i32
    %c0_i32_0 = arith.constant 0 : i32
    %c0_i32_1 = arith.constant 0 : i32
    return %arg0, %c0_i32, %c0_i32_0 : i32, i32, i32
  }
  func.func @transform_17(%arg0: i32) -> (i32, i32, i32) {
    %c0_i32 = arith.constant 0 : i32
    %c0_i32_0 = arith.constant 0 : i32
    %c0_i32_1 = arith.constant 0 : i32
    return %arg0, %c0_i32, %c0_i32_0 : i32, i32, i32
  }
  func.func @transform_18(%arg0: i32) -> (i32, i32) {
    %c0_i32 = arith.constant 0 : i32
    %c0_i32_0 = arith.constant 0 : i32
    %c0_i32_1 = arith.constant 0 : i32
    return %c0_i32, %c0_i32_0 : i32, i32
  }
  func.func @transform_19(%arg0: i32) -> (i32, i32) {
    %c0_i32 = arith.constant 0 : i32
    %c0_i32_0 = arith.constant 0 : i32
    %c0_i32_1 = arith.constant 0 : i32
    return %c0_i32, %c0_i32_0 : i32, i32
  }
  func.func @transform_20(%arg0: i32) -> (i32, i32) {
    %c0_i32 = arith.constant 0 : i32
    %c0_i32_0 = arith.constant 0 : i32
    %c0_i32_1 = arith.constant 0 : i32
    return %c0_i32, %c0_i32_0 : i32, i32
  }
}

</mosaic_0001>

<bundles_post_ra>
// kernel: tpu_custom_call.1
= control target key start
LH: loop header
LB: loop body
LE: loop exit
PB: predicated region body
PF: predicated region fallthrough
CT: control target
= control target key end

     0   :  { %s4546_s0 = inlined_call_operand.vmem [shape: f32[16,32], index: 0, kind: input, shape index: {}]   ;;  %s4547_s1 = inlined_call_operand.vmem [shape: f32[2,1,8], index: 1, kind: input, shape index: {}]   ;;  %s4548_s2 = inlined_call_operand.vmem [shape: bf16[2,4,32,8], index: 2, kind: input, shape index: {}]   ;;  %s4549_s3 = inlined_call_operand.vmem [shape: f32[2,4,1,8], index: 3, kind: input, shape index: {}]   ;;  %s4550_s4 = inlined_call_operand.vmem [shape: bf16[2,4,32,8], index: 4, kind: input, shape index: {}]   ;;  %s4551_s5 = inlined_call_operand.vmem [shape: f32[2,4,1,8], index: 5, kind: input, shape index: {}]   ;;  %s4552_s6 = inlined_call_operand.vmem [shape: bf16[2,4,32,8], index: 6, kind: input, shape index: {}]   ;;  %s4553_s7 = inlined_call_operand.vmem [shape: f32[2,4,1,8], index: 7, kind: input, shape index: {}]   ;;  %s4554_s8 = inlined_call_operand.vmem [shape: bf16[2,4,8,32], index: 8, kind: input, shape index: {}]   ;;  %s4555_s9 = inlined_call_operand.vmem [shape: f32[2,1,32], index: 9, kind: input, shape index: {}]   ;;  %s4556_s10 = inlined_call_operand.vmem [shape: f32[2,1,32], index: 10, kind: input, shape index: {}]   ;;  %s4557_s11 = inlined_call_operand.vmem [shape: f32[2,1,32], index: 11, kind: input, shape index: {}]   ;;  %s4558_s12 = inlined_call_operand.vmem [shape: bf16[2,32,64], index: 12, kind: input, shape index: {}]   ;;  %s4559_s13 = inlined_call_operand.vmem [shape: f32[2,1,64], index: 13, kind: input, shape index: {}]   ;;  %s4560_s14 = inlined_call_operand.vmem [shape: bf16[2,64,32], index: 14, kind: input, shape index: {}]   ;;  %s4561_s15 = inlined_call_operand.vmem [shape: f32[2,1,32], index: 15, kind: input, shape index: {}]   ;;  %s4562_s16 = inlined_call_operand.vmem [shape: f32[2,1,32], index: 16, kind: input, shape index: {}]   ;;  %s4563_s17 = inlined_call_operand.vmem [shape: f32[2,1,32], index: 17, kind: input, shape index: {}]   ;;  %s4564_s18 = inlined_call_operand.vmem [shape: f32[1,32], index: 18, kind: input, shape index: {}]   ;;  %s4565_s19 = inlined_call_operand.vmem [shape: f32[1,32], index: 19, kind: input, shape index: {}]   ;;  %s4566_s20 = inlined_call_operand.hbm [shape: f32[16,32], index: 20, kind: output, shape index: {}]  }
   0x1   :  { %4576 = sst [smem:[#allocation10_spill]] %s4546_s0 }
   0x2   :  { %4577 = sst [smem:[#allocation11_spill]] %s4547_s1 }
   0x3   :  { %4578 = sst [smem:[#allocation12_spill]] %s4548_s2 }
   0x4   :  { %4579 = sst [smem:[#allocation13_spill]] %s4549_s3 }
   0x5   :  { %4580 = sst [smem:[#allocation14_spill]] %s4550_s4 }
   0x6   :  { %4581 = sst [smem:[#allocation15_spill]] %s4551_s5 }
   0x7   :  { %4582 = sst [smem:[#allocation16_spill]] %s4552_s6 }
   0x8   :  { %4583 = sst [smem:[#allocation17_spill]] %s4553_s7 }
   0x9   :  { %4584 = sst [smem:[#allocation18_spill]] %s4554_s8 }
   0xa   :  { %4585 = sst [smem:[#allocation19_spill]] %s4564_s18 }
   0xb   :  { %4586 = sst [smem:[#allocation20_spill]] %s4565_s19 }
   0xc   :  { %4587 = sst [smem:[#allocation21_spill]] %s4566_s20 }
   0xd   :  { %25 = vsyncpa [#allocation3], 0  ;;  %s4065_s1 = smov 0  }
   0xe LB: > { %4588 = sst [smem:[#allocation5_spill]] %s3953_s1  ;;  %s4071_s22 = sadd.s32 4294967295, %s3953_s1   ;;  %s3953_s1 = sphi %s4065_s1, %s31_s1  }
   0xf   : > { %4589 = sst [smem:[#allocation6_spill]] %s4071_s22  ;;  %p3328_p0 = scmp.ge.s32.totalorder %s3953_s1, 1 }
  0x10   : > { %p691_p1 = scmp.lt.s32.totalorder %s3953_s1, 3 }
  0x12   : > { %p692_p2 = pnand %p3328_p0, %p691_p1 }
  0x14   : > { %695 = sbr.rel (%p692_p2) target bundleno = 5450 (0x154a), region = 100 }
  0x1b   : > { %p802_p3 = scmp.lt.s32.totalorder %s4071_s22, 1  ;;  %s4590_s26 = sld [smem:[#allocation12_spill]] }
  0x1c   : > { %s4592_s29 = sld [smem:[#allocation13_spill]]  ;;  %s4594_s1 = sld [smem:[#allocation14_spill]] }
  0x1d   : > { %s4077_s23 = scalar_select %p802_p3, %s4071_s22, 1 }
  0x1e   : > { %s4596_s5 = sld [smem:[#allocation15_spill]]  ;;  %s4597_s6 = sld [smem:[#allocation16_spill]] }
  0x1f   : > { %s3484_s24 = sshll.u32 %s4077_s23, 6  ;;  %s3331_s2 = sshll.u32 %s4077_s23, 2 }
  0x20   : > { %s4598_s7 = sld [smem:[#allocation17_spill]]  ;;  %s4599_s8 = sld [smem:[#allocation18_spill]] }
  0x21   : > { %s4084_s27 = scalar_lea.vmem %s4590_s26, %s3484_s24  ;;  %s858_s25 = scalar_lea.vmem %s4561_s15, %s4077_s23 }
  0x22   : > { %4591 = sst [smem:[#allocation7_spill]] %s4084_s27  ;;  %s4089_s30 = scalar_lea.vmem %s4592_s29, %s3331_s2 }
  0x23   : > { %4593 = sst [smem:[#allocation8_spill]] %s4089_s30  ;;  %s4094_s20 = scalar_lea.vmem %s4594_s1, %s3484_s24 }
  0x24   : > { %4595 = sst [smem:[#allocation9_spill]] %s4094_s20  ;;  %s4099_s22 = scalar_lea.vmem %s4596_s5, %s3331_s2 }
  0x25   : > { %s4104_s26 = scalar_lea.vmem %s4597_s6, %s3484_s24  ;;  %s3487_s30 = sshll.u32 %s4077_s23, 4 }
  0x26   : > { %s4109_s29 = scalar_lea.vmem %s4598_s7, %s3331_s2  ;;  %s4119_s18 = scalar_lea.vmem %s4599_s8, %s3487_s30 }
  0x27   : > { %s4132_s6 = scalar_lea.vmem %s4558_s12, %s3487_s30  ;;  %s3489_s20 = sshll.u32 %s4077_s23, 5 }
  0x28   : > { %s4142_s8 = scalar_lea.vmem %s4560_s14, %s3489_s20  ;;  %s861_s2 = scalar_lea.vmem %s4562_s16, %s4077_s23 }
  0x29   : > { %s864_s24 = scalar_lea.vmem %s4563_s17, %s4077_s23  ;;  %s4600_s0 = sld [smem:[#allocation6_spill]] }
  0x2f   : > { %p3344_p4 = scmp.ne.s32.totalorder %s4600_s0, 0 }
  0x30   : > { %s4601_s7 = sld [smem:[#allocation10_spill]] (!%p3344_p4)  ;;  %vm872_vm0 = vcmask (!%p3344_p4), 261120  }
  0x31   : > { %869 = sbr.rel (%p3344_p4) target bundleno = 56 (0x38), region = 104 }
  0x36   : > { %v870_v0 = vld [vmem:[%s4601_s7] sm:$0xff] (!%p3344_p4)  ;;  %v871_v1 = vld [vmem:[%s4601_s7 + $0x8] sm:$0xff] (!%p3344_p4) }
  0x37   : > { %873 = vst.msk [vmem:[#allocation2] sm:$0xff] (!%p3344_p4), %vm872_vm0, %v870_v0  ;;  %874 = vst.msk [vmem:[#allocation2 + $0x8] sm:$0xff] (!%p3344_p4), %vm872_vm0, %v871_v1 }
  0x38 PF: > { %vm885_vm1 = vcmask 261120   ;;  %s4602_s28 = sld [smem:[#allocation7_spill]]  ;;  %s4603_s5 = sld [smem:[#allocation9_spill]]  ;;  %v3955_v18 = vmov 0.0   ;;  %vm3956_vm2 = vmmov 0   ;;  %v3833_v47 = vld [vmem:[%s4104_s26] sm:$0xff]  }
  0x39   : > { %3574 = vmatprep.subr.bf16.mxu0 %v3955_v18  ;;  %3582 = vmatprep.subr.bf16.mxu1 %v3955_v18  ;;  %s4604_s3 = scalar_lea.vmem %s4556_s10, %s4077_s23  ;;  %s4605_s0 = scalar_lea.vmem %s4557_s11, %s4077_s23  ;;  %v3834_v49 = vld [vmem:[%s4104_s26 + $0x8] sm:$0xff]   ;;  %v3351_v50 = vld [vmem:[%s4099_s22] ss:$0 sm:$0xff]  ;;  %vm1145_vm7 = vcmask 64512   ;;  %vm1281_vm8 = vcmask 1043456   ;;  %vm3001_vm15 = vcmask 523264  }
  0x3a   : > { %3578 = vmatprep.mubr.msk.bf16.mxu0 %vm3956_vm2, %v3955_v18  ;;  %3586 = vmatprep.mubr.msk.bf16.mxu1 %vm3956_vm2, %v3955_v18  ;;  %v3345_v37 = vld [vmem:[%s4604_s3] ss:$0 sm:$0xff]  ;;  %s4606_s21 = sld [smem:[#allocation8_spill]]  ;;  %s4607_s1 = sld [smem:[#allocation11_spill]] }
  0x3b   : > { %v3346_v43 = vld [vmem:[%s4605_s0] ss:$0 sm:$0xff]  ;;  %s4610_s0 = scalar_lea.vmem %s4559_s13, %s4077_s23 }
  0x3c   : > { %v3355_v1 = vld [vmem:[%s4109_s29] ss:$0 sm:$0xff] }
  0x3e   : > { %v875_v2 = vld [vmem:[#allocation2] sm:$0xff]  ;;  %v876_v3 = vld [vmem:[#allocation2 + $0x8] sm:$0xff] }
  0x3f   : > { %v886_v4 = vsel %vm885_vm1, %v875_v2, 0.0  ;;  %v889_v5 = vsel %vm885_vm1, %v876_v3, 0.0  ;;  %v3829_v16 = vld [vmem:[%s4602_s28] sm:$0xff]   ;;  %v3831_v19 = vld [vmem:[%s4602_s28 + $0x8] sm:$0xff]  }
  0x40   : > { %887 = vadd.xlane.f32.xlu0 %v886_v4  ;;  %v3830_v17 = vld [vmem:[%s4603_s5] sm:$0xff]   ;;  %3575 = vmatpush3.bf16.msra.mxu0 %v3829_v16  ;;  %v3832_v20 = vld [vmem:[%s4603_s5 + $0x8] sm:$0xff]   ;;  %s4608_s19 = smov %s4607_s1 }
  0x41   : > { %3583 = vmatpush3.bf16.msra.mxu1 %v3830_v17  ;;  %3576 = vmatprep.subr.bf16.mxu0 %v3955_v18  ;;  %v3347_v62 = vld [vmem:[%s4606_s21] ss:$0 sm:$0xff]  ;;  %v1242_v17 = vlaneseq }
  0x42   : > { %3584 = vmatprep.subr.bf16.mxu1 %v3955_v18 }
  0x44   : > { %890 = vadd.xlane.f32.xlu0 %v889_v5  ;;  %3577 = vmatpush3.bf16.msra.mxu0 %v3831_v19  ;;  %v877_v19 = vld [vmem:[%s4607_s1] sm:$0x1] }
  0x45   : > { %3585 = vmatpush3.bf16.msra.mxu1 %v3832_v20  ;;  %3590 = vmatprep.subr.bf16.mxu0 %v3955_v18  ;;  %v1243_v20 = vshrl.u32 %v1242_v17, 7  ;;  %vm879_vm9 = vcmp.eq.f32.partialorder %v877_v19, 0.0 }
  0x46   : > { %3598 = vmatprep.subr.bf16.mxu1 %v3955_v18 }
  0xcd   : > { %v888_v6 = vpop.xlane.xlu0 %887 }
  0xce   : > { %v893_v7 = vmul.f32 0.03125, %v888_v6 }
  0xd0   : > { %v895_v8 = vsub.f32 %v875_v2, %v893_v7 }
  0xd1   : > { %v891_v9 = vpop.xlane.xlu0 %890 }
  0xd2   : > { %v894_v10 = vmul.f32 0.03125, %v891_v9  ;;  %v897_v11 = vmul.f32 %v895_v8, %v895_v8  ;;  %v931_v39 = vmul.f32 %v3345_v37, %v895_v8 }
  0xd4   : > { %v896_v12 = vsub.f32 %v876_v3, %v894_v10  ;;  %v899_v13 = vsel %vm885_vm1, %v897_v11, 0.0 }
  0xd5   : > { %900 = vadd.xlane.f32.xlu1 %v899_v13 }
  0xd6   : > { %v898_v14 = vmul.f32 %v896_v12, %v896_v12  ;;  %v932_v40 = vmul.f32 %v3345_v37, %v896_v12 }
  0xd8   : > { %v902_v15 = vsel %vm885_vm1, %v898_v14, 0.0 }
  0xd9   : > { %903 = vadd.xlane.f32.xlu1 %v902_v15 }
 0x162   : > { %v901_v21 = vpop.xlane.xlu1 %900 }
 0x163   : > { %v905_v22 = vmul.f32 0.032258064, %v901_v21  ;;  %v878_v21 = vld [vmem:[%s4608_s19 + $0x1] sm:$0x1] }
 0x164   : > { %vm880_vm10 = vcmp.eq.f32.partialorder %v878_v21, 0.0 }
 0x165   : > { %3859 = vrsqrt.f32 %v905_v22  ;;  %vm909_vm3 = vcmp.eq.f32.partialorder %v905_v22, inf  ;;  %v912_v27 = vand.u32 2147483648, %v905_v22  ;;  %vm911_vm4 = vcmp.eq.f32.partialorder %v905_v22, 0.0 }
 0x166   : > { %v904_v23 = vpop.xlane.xlu1 %903 }
 0x167   : > { %v906_v24 = vmul.f32 0.032258064, %v904_v23  ;;  %v881_v23 = vsel %vm879_vm9, -1e+09, %v3955_v18 }
 0x169   : > { %3861 = vrsqrt.f32 %v906_v24  ;;  %vm916_vm5 = vcmp.eq.f32.partialorder %v906_v24, inf  ;;  %v919_v33 = vand.u32 2147483648, %v906_v24  ;;  %vm918_vm6 = vcmp.eq.f32.partialorder %v906_v24, 0.0 }
 0x16f   : > { %v3860_v25 = vpop.eup %3859 }
 0x170   : > { %v908_v26 = vmul.f32 %v3860_v25, %v905_v22 }
 0x172   : > { %v910_v28 = vsel %vm909_vm3, %v905_v22, %v908_v26  ;;  %v1244_v22 = vsub.s32 0, %v1243_v20 }
 0x173   : > { %v3862_v29 = vpop.eup %3861  ;;  %v913_v30 = vsel %vm911_vm4, %v912_v27, %v910_v28 }
 0x174   : > { %v921_v31 = vadd.f32 1e-08, %v913_v30  ;;  %v915_v32 = vmul.f32 %v3862_v29, %v906_v24  ;;  %v4234_v25 = vrot.slane %v881_v23, %v1244_v22 }
 0x176   : > { %3863 = vrcp.f32 %v921_v31  ;;  %v917_v34 = vsel %vm916_vm5, %v906_v24, %v915_v32  ;;  %v882_v24 = vsel %vm880_vm10, -1e+09, %v3955_v18 }
 0x177   : > { %v920_v35 = vsel %vm918_vm6, %v919_v33, %v917_v34  ;;  %v4236_v29 = vrot.slane %v882_v24, %v1244_v22  ;;  %v3368_v24 = vld [vmem:[%s4606_s21 + $0x1] ss:$0 sm:$0xff] }
 0x178   : > { %v922_v36 = vadd.f32 1e-08, %v920_v35 }
 0x17a   : > { %3865 = vrcp.f32 %v922_v36 }
 0x180   : > { %v3864_v38 = vpop.eup %3863 }
 0x181   : > { %v933_v41 = vmul.f32 %v3864_v38, %v931_v39 }
 0x183   : > { %v941_v45 = vadd.f32 %v3346_v43, %v933_v41 }
 0x184   : > { %v3866_v42 = vpop.eup %3865 }
 0x185   : > { %v934_v44 = vmul.f32 %v3866_v42, %v932_v40 }
 0x187   : > { %v942_v46 = vadd.f32 %v3346_v43, %v934_v44 }
 0x189   : > { %v4192_v48 = vpack.c.bf16 %v942_v46, %v941_v45 }
 0x18b   : > { %3579 = vmatmul.mubr.msk.bf16.vlgmr.msra.gmra.mrb[0].mxu0 %vm885_vm1, %v4192_v48  ;;  %3587 = vmatmul.mubr.msk.bf16.vlgmr.msra.gmra.mrb[0].mxu1 %vm885_vm1, %v4192_v48 }
 0x18c   : > { %3591 = vmatpush3.bf16.msra.mxu0 %v3833_v47  ;;  %3594 = vmatprep.mubr.msk.bf16.mxu0 %vm3956_vm2, %v3955_v18 }
 0x18d   : > { %3592 = vmatprep.subr.bf16.mxu0 %v3955_v18  ;;  %3600 = vmatprep.mubr.msk.bf16.mxu1 %vm3956_vm2, %v3955_v18 }
 0x190   : > { %3593 = vmatpush3.bf16.msra.mxu0 %v3834_v49 }
 0x191   : > { %3604 = vmatprep.subr.bf16.mxu0 %v3955_v18 }
 0x193   : > { %3595 = vmatmul.mubr.msk.bf16.vlgmr.msra.gmra.mrb[4].mxu0 %vm885_vm1, %v4192_v48 }
 0x194   : > { %3606 = vmatprep.mubr.msk.bf16.mxu0 %vm3956_vm2, %v3955_v18 }
 0x25e   : > { %v1004_v51 = vpop.f32.mrb[0].mxu0  ;;  %v1068_v52 = vpop.f32.mrb[0].mxu1 }
 0x25f   : > { %v1069_v53 = vadd.f32 %v3351_v50, %v1068_v52  ;;  %v3580_v54 = vpop.f32.mrb[1].mxu0  ;;  %v3588_v55 = vpop.f32.mrb[1].mxu1  ;;  %v1005_v2 = vadd.f32 %v3347_v62, %v1004_v51 }
 0x260   : > { %v1007_v56 = vpop.f32.mrb[2].mxu0  ;;  %v1071_v57 = vpop.f32.mrb[2].mxu1 }
 0x261   : > { %v1141_v58 = vpack.c.bf16 %v1069_v53, %v1069_v53  ;;  %v1072_v59 = vadd.f32 %v3351_v50, %v1071_v57  ;;  %v3581_v60 = vpop.f32.mrb[3].mxu0  ;;  %v3589_v61 = vpop.f32.mrb[3].mxu1  ;;  %v1008_v5 = vadd.f32 %v3347_v62, %v1007_v56  ;;  %v1139_v9 = vpack.c.bf16 %v1005_v2, %v1005_v2  ;;  %v3835_v57 = vld [vmem:[%s4602_s28 + $0x10] sm:$0xff]   ;;  %v3837_v62 = vld [vmem:[%s4602_s28 + $0x18] sm:$0xff]  }
 0x262   : > { %v3836_v60 = vld [vmem:[%s4603_s5 + $0x10] sm:$0xff]  }
 0x263   : > { %v1150_v63 = vsel %vm1145_vm7, %v1141_v58, 0  ;;  %v1142_v0 = vpack.c.bf16 %v1072_v59, %v1072_v59  ;;  %v1140_v13 = vpack.c.bf16 %v1008_v5, %v1008_v5 }
 0x264   : > { %3599 = vmatpush3.bf16.xpose.msra.mxu1 %v1150_v63  ;;  %v3838_v63 = vld [vmem:[%s4603_s5 + $0x18] sm:$0xff]  }
 0x265   : > { %v1196_v3 = vsel %vm1145_vm7, %v1142_v0, 0  ;;  %3610 = vmatprep.subr.bf16.mxu1 %v3955_v18  ;;  %v3839_v0 = vld [vmem:[%s4104_s26 + $0x10] sm:$0xff]  }
 0x266   : > { %v1132_v4 = vpop.f32.mrb[4].mxu0  ;;  %3605 = vmatpush3.bf16.xpose.msra.mxu0 %v1196_v3 }
 0x267   : > { %v1133_v6 = vadd.f32 %v3355_v1, %v1132_v4  ;;  %v3596_v7 = vpop.f32.mrb[5].mxu0  ;;  %3616 = vmatprep.subr.bf16.mxu0 %v3955_v18 }
 0x268   : > { %v1135_v8 = vpop.f32.mrb[6].mxu0 }
 0x269   : > { %v1143_v10 = vpack.c.bf16 %v1133_v6, %v1133_v6  ;;  %v1136_v11 = vadd.f32 %v3355_v1, %v1135_v8  ;;  %v3597_v12 = vpop.f32.mrb[7].mxu0  ;;  %v3840_v1 = vld [vmem:[%s4104_s26 + $0x18] sm:$0xff]  }
 0x26a   : > { %v3377_v12 = vld [vmem:[%s4099_s22 + $0x1] ss:$0 sm:$0xff] }
 0x26b   : > { %v1283_v14 = vsel %vm1281_vm8, %v1143_v10, 0  ;;  %v1144_v15 = vpack.c.bf16 %v1136_v11, %v1136_v11  ;;  %3601 = vmatmul.mubr.msk.bf16.vlgmr.msra.gmra.mrb[4].mxu1 %vm1145_vm7, %v1139_v9 }
 0x26c   : > { %3611 = vmatpush3.bf16.msra.mxu1 %v1283_v14  ;;  %3612 = vmatprep.mubr.msk.bf16.mxu1 %vm3956_vm2, %v3955_v18 }
 0x26d   : > { %v1329_v16 = vsel %vm1281_vm8, %v1144_v15, 0  ;;  %3607 = vmatmul.mubr.msk.bf16.vlgmr.msra.gmra.mrb[8].mxu0 %vm1145_vm7, %v1140_v13  ;;  %3622 = vmatprep.subr.bf16.mxu1 %v3955_v18 }
 0x26e   : > { %3617 = vmatpush3.bf16.msra.mxu0 %v1329_v16  ;;  %3618 = vmatprep.mubr.msk.bf16.mxu0 %vm3956_vm2, %v3955_v18 }
 0x26f   : > { %3630 = vmatprep.subr.bf16.mxu0 %v3955_v18 }
 0x33e   : > { %v1186_v26 = vpop.f32.mrb[4].mxu1 }
 0x33f   : > { %v1238_v27 = vmul.f32 0.35355338, %v1186_v26  ;;  %v3602_v28 = vpop.f32.mrb[5].mxu1  ;;  %v3386_v26 = vld [vmem:[%s4109_s29 + $0x1] ss:$0 sm:$0xff] }
 0x340   : > { %v1189_v30 = vpop.f32.mrb[6].mxu1  ;;  %v1232_v31 = vpop.f32.mrb[8].mxu0 }
 0x341   : > { %v1239_v32 = vmul.f32 0.35355338, %v1232_v31  ;;  %v3603_v33 = vpop.f32.mrb[7].mxu1  ;;  %v3608_v34 = vpop.f32.mrb[9].mxu0  ;;  %v1252_v35 = vadd.f32 %v4234_v25, %v1238_v27 }
 0x342   : > { %v1235_v36 = vpop.f32.mrb[10].mxu0 }
 0x343   : > { %v3609_v37 = vpop.f32.mrb[11].mxu0  ;;  %v1254_v38 = vsel %vm1145_vm7, %v1252_v35, -inf  ;;  %v1253_v39 = vadd.f32 %v4236_v29, %v1239_v32 }
 0x344   : > { %1255 = vmax.xlane.f32.xlu1 %v1254_v38 }
 0x345   : > { %v1257_v40 = vsel %vm1145_vm7, %v1253_v39, -inf }
 0x346   : > { %1258 = vmax.xlane.f32.xlu0 %v1257_v40 }
 0x3d1   : > { %v1256_v41 = vpop.xlane.xlu1 %1255 }
 0x3d2   : > { %v1260_v42 = vsub.f32 %v1252_v35, %v1256_v41 }
 0x3d3   : > { %v1259_v43 = vpop.xlane.xlu0 %1258 }
 0x3d4   : > { %v1262_v44 = vmul.f32 1.442695, %v1260_v42  ;;  %v1261_v45 = vsub.f32 %v1253_v39, %v1259_v43 }
 0x3d6   : > { %3867 = vpow2.f32 %v1262_v44  ;;  %v1264_v46 = vmul.f32 1.442695, %v1261_v45 }
 0x3d8   : > { %3869 = vpow2.f32 %v1264_v46 }
 0x3e0   : > { %v3868_v47 = vpop.eup %3867 }
 0x3e1   : > { %v1266_v49 = vsel %vm1145_vm7, %v3868_v47, 0.0 }
 0x3e2   : > { %v3870_v50 = vpop.eup %3869  ;;  %1267 = vadd.xlane.f32.xlu1 %v1266_v49 }
 0x3e3   : > { %v1269_v51 = vsel %vm1145_vm7, %v3870_v50, 0.0 }
 0x3e4   : > { %1270 = vadd.xlane.f32.xlu0 %v1269_v51 }
 0x46f   : > { %v1268_v52 = vpop.xlane.xlu1 %1267 }
 0x470   : > { %3871 = vrcp.f32 %v1268_v52 }
 0x471   : > { %v1271_v53 = vpop.xlane.xlu0 %1270 }
 0x472   : > { %3873 = vrcp.f32 %v1271_v53 }
 0x47a   : > { %v3872_v54 = vpop.eup %3871 }
 0x47b   : > { %v1274_v55 = vmul.f32 %v3872_v54, %v3868_v47 }
 0x47c   : > { %v3874_v56 = vpop.eup %3873 }
 0x47d   : > { %v1275_v58 = vmul.f32 %v3874_v56, %v3870_v50  ;;  %v1276_v59 = vpack.c.bf16 %v1274_v55, %v1274_v55 }
 0x47f   : > { %3613 = vmatmul.mubr.msk.bf16.vlgmr.msra.gmra.mrb[8].mxu1 %vm1145_vm7, %v1276_v59  ;;  %v1277_v61 = vpack.c.bf16 %v1275_v58, %v1275_v58 }
 0x480   : > { %3623 = vmatpush3.bf16.msra.mxu1 %v3835_v57  ;;  %3626 = vmatprep.mubr.msk.bf16.mxu1 %vm3956_vm2, %v3955_v18 }
 0x481   : > { %3619 = vmatmul.mubr.msk.bf16.vlgmr.msra.gmra.mrb[12].mxu0 %vm1145_vm7, %v1277_v61  ;;  %3624 = vmatprep.subr.bf16.mxu1 %v3955_v18 }
 0x482   : > { %3631 = vmatpush3.bf16.msra.mxu0 %v3836_v60  ;;  %3634 = vmatprep.mubr.msk.bf16.mxu0 %vm3956_vm2, %v3955_v18 }
 0x483   : > { %3632 = vmatprep.subr.bf16.mxu0 %v3955_v18 }
 0x484   : > { %3625 = vmatpush3.bf16.msra.mxu1 %v3837_v62 }
 0x485   : > { %3638 = vmatprep.subr.bf16.mxu1 %v3955_v18 }
 0x486   : > { %3633 = vmatpush3.bf16.msra.mxu0 %v3838_v63 }
 0x487   : > { %3627 = vmatmul.mubr.msk.bf16.vlgmr.msra.gmra.mrb[12].mxu1 %vm885_vm1, %v4192_v48  ;;  %3646 = vmatprep.subr.bf16.mxu0 %v3955_v18 }
 0x488   : > { %3639 = vmatpush3.bf16.msra.mxu1 %v3839_v0  ;;  %3642 = vmatprep.mubr.msk.bf16.mxu1 %vm3956_vm2, %v3955_v18 }
 0x489   : > { %3635 = vmatmul.mubr.msk.bf16.vlgmr.msra.gmra.mrb[16].mxu0 %vm885_vm1, %v4192_v48  ;;  %3640 = vmatprep.subr.bf16.mxu1 %v3955_v18 }
 0x48a   : > { %3648 = vmatprep.mubr.msk.bf16.mxu0 %vm3956_vm2, %v3955_v18 }
 0x48c   : > { %3641 = vmatpush3.bf16.msra.mxu1 %v3840_v1 }
 0x48d   : > { %3652 = vmatprep.subr.bf16.mxu1 %v3955_v18 }
 0x48f   : > { %3643 = vmatmul.mubr.msk.bf16.vlgmr.msra.gmra.mrb[16].mxu1 %vm885_vm1, %v4192_v48 }
 0x490   : > { %3654 = vmatprep.mubr.msk.bf16.mxu1 %vm3956_vm2, %v3955_v18 }
 0x552   : > { %v4274_v2 = vpop.f32.mrb[8].mxu1 }
 0x553   : > { %v3614_v3 = vpop.f32.mrb[9].mxu1 }
 0x554   : > { %v1322_v4 = vpop.f32.mrb[10].mxu1  ;;  %v4276_v5 = vpop.f32.mrb[12].mxu0 }
 0x555   : > { %v1371_v6 = vpack.c.bf16 %v4276_v5, %v4274_v2  ;;  %v3615_v7 = vpop.f32.mrb[11].mxu1  ;;  %v3620_v8 = vpop.f32.mrb[13].mxu0 }
 0x556   : > { %v1368_v9 = vpop.f32.mrb[14].mxu0 }
 0x557   : > { %v3621_v10 = vpop.f32.mrb[15].mxu0 }
 0x55a   : > { %v1432_v11 = vpop.f32.mrb[12].mxu1 }
 0x55b   : > { %v3628_v13 = vpop.f32.mrb[13].mxu1  ;;  %v1433_v31 = vadd.f32 %v3368_v24, %v1432_v11 }
 0x55c   : > { %v1435_v14 = vpop.f32.mrb[14].mxu1  ;;  %v1498_v15 = vpop.f32.mrb[16].mxu0 }
 0x55d   : > { %v1499_v16 = vadd.f32 %v3377_v12, %v1498_v15  ;;  %v3629_v17 = vpop.f32.mrb[15].mxu1  ;;  %v3636_v19 = vpop.f32.mrb[17].mxu0  ;;  %v1436_v36 = vadd.f32 %v3368_v24, %v1435_v14  ;;  %v1571_v40 = vpack.c.bf16 %v1433_v31, %v1433_v31  ;;  %v1372_v15 = vld [vmem:[%s4119_s18] sm:$0xf] }
 0x55e   : > { %v1501_v20 = vpop.f32.mrb[18].mxu0 }
 0x55f   : > { %v1573_v21 = vpack.c.bf16 %v1499_v16, %v1499_v16  ;;  %v1502_v22 = vadd.f32 %v3377_v12, %v1501_v20  ;;  %v3637_v23 = vpop.f32.mrb[19].mxu0  ;;  %v1572_v42 = vpack.c.bf16 %v1436_v36, %v1436_v36  ;;  %v3394_v12 = vld [vmem:[%s4119_s18 + $0x4] sm:$0xf] }
 0x560   : > { %v1796_v19 = vsel %vm1281_vm8, %v3394_v12, 0  ;;  %v3842_v23 = vld [vmem:[%s4603_s5 + $0x28] sm:$0xff]  }
 0x561   : > { %v1581_v27 = vsel %vm1145_vm7, %v1573_v21, 0  ;;  %v1574_v28 = vpack.c.bf16 %v1502_v22, %v1502_v22  ;;  %v1843_v21 = vsel %vm1281_vm8, %v1372_v15, 0  ;;  %v3841_v22 = vld [vmem:[%s4603_s5 + $0x20] sm:$0xff]  }
 0x562   : > { %v1564_v30 = vpop.f32.mrb[16].mxu1  ;;  %3647 = vmatpush3.bf16.xpose.msra.mxu0 %v1581_v27 }
 0x563   : > { %v1627_v32 = vsel %vm1145_vm7, %v1574_v28, 0  ;;  %v1565_v33 = vadd.f32 %v3386_v26, %v1564_v30  ;;  %v3644_v34 = vpop.f32.mrb[17].mxu1  ;;  %3658 = vmatprep.subr.bf16.mxu0 %v3955_v18 }
 0x564   : > { %v1567_v35 = vpop.f32.mrb[18].mxu1  ;;  %3653 = vmatpush3.bf16.xpose.msra.mxu1 %v1627_v32 }
 0x565   : > { %v1575_v37 = vpack.c.bf16 %v1565_v33, %v1565_v33  ;;  %v1568_v38 = vadd.f32 %v3386_v26, %v1567_v35  ;;  %v3645_v39 = vpop.f32.mrb[19].mxu1  ;;  %3664 = vmatprep.subr.bf16.mxu1 %v3955_v18  ;;  %v3843_v26 = vld [vmem:[%s4602_s28 + $0x20] sm:$0xff]   ;;  %v3844_v33 = vld [vmem:[%s4602_s28 + $0x28] sm:$0xff]  }
 0x566   : > { %v3845_v35 = vld [vmem:[%s4104_s26 + $0x20] sm:$0xff]   ;;  %v3846_v39 = vld [vmem:[%s4104_s26 + $0x28] sm:$0xff]  }
 0x567   : > { %v1576_v41 = vpack.c.bf16 %v1568_v38, %v1568_v38  ;;  %v1701_v43 = vsel %vm1281_vm8, %v1575_v37, 0 }
 0x569   : > { %3649 = vmatmul.mubr.msk.bf16.vlgmr.msra.gmra.mrb[20].mxu0 %vm1145_vm7, %v1571_v40  ;;  %v1747_v44 = vsel %vm1281_vm8, %v1576_v41, 0  ;;  %v3411_v40 = vld [vmem:[%s4099_s22 + $0x2] ss:$0 sm:$0xff] }
 0x56a   : > { %3659 = vmatpush3.bf16.msra.mxu0 %v1701_v43  ;;  %3660 = vmatprep.mubr.msk.bf16.mxu0 %vm3956_vm2, %v3955_v18 }
 0x56b   : > { %3655 = vmatmul.mubr.msk.bf16.vlgmr.msra.gmra.mrb[20].mxu1 %vm1145_vm7, %v1572_v42  ;;  %3670 = vmatprep.subr.bf16.mxu0 %v3955_v18 }
 0x56c   : > { %3665 = vmatpush3.bf16.msra.mxu1 %v1747_v44  ;;  %3666 = vmatprep.mubr.msk.bf16.mxu1 %vm3956_vm2, %v3955_v18 }
 0x56d   : > { %3676 = vmatprep.subr.bf16.mxu1 %v3955_v18 }
 0x63c   : > { %v1617_v45 = vpop.f32.mrb[20].mxu0 }
 0x63d   : > { %v1669_v46 = vmul.f32 0.35355338, %v1617_v45  ;;  %v3650_v47 = vpop.f32.mrb[21].mxu0 }
 0x63e   : > { %v1620_v49 = vpop.f32.mrb[22].mxu0  ;;  %v1663_v50 = vpop.f32.mrb[20].mxu1 }
 0x63f   : > { %v1670_v51 = vmul.f32 0.35355338, %v1663_v50  ;;  %v3651_v52 = vpop.f32.mrb[23].mxu0  ;;  %v3656_v53 = vpop.f32.mrb[21].mxu1  ;;  %v1671_v54 = vadd.f32 %v1669_v46, %v4234_v25 }
 0x640   : > { %v1666_v55 = vpop.f32.mrb[22].mxu1 }
 0x641   : > { %v3657_v56 = vpop.f32.mrb[23].mxu1  ;;  %v1673_v57 = vsel %vm1145_vm7, %v1671_v54, -inf  ;;  %v1672_v58 = vadd.f32 %v1670_v51, %v4236_v29 }
 0x642   : > { %1674 = vmax.xlane.f32.xlu0 %v1673_v57 }
 0x643   : > { %v1676_v59 = vsel %vm1145_vm7, %v1672_v58, -inf }
 0x644   : > { %1677 = vmax.xlane.f32.xlu1 %v1676_v59 }
 0x6cf   : > { %v1675_v60 = vpop.xlane.xlu0 %1674 }
 0x6d0   : > { %v1679_v61 = vsub.f32 %v1671_v54, %v1675_v60 }
 0x6d1   : > { %v1678_v62 = vpop.xlane.xlu1 %1677 }
 0x6d2   : > { %v1681_v63 = vmul.f32 1.442695, %v1679_v61  ;;  %v1680_v0 = vsub.f32 %v1672_v58, %v1678_v62  ;;  %v3402_v58 = vld [vmem:[%s4606_s21 + $0x2] ss:$0 sm:$0xff] }
 0x6d4   : > { %3875 = vpow2.f32 %v1681_v63  ;;  %v1683_v1 = vmul.f32 1.442695, %v1680_v0 }
 0x6d6   : > { %3877 = vpow2.f32 %v1683_v1 }
 0x6de   : > { %v3876_v3 = vpop.eup %3875 }
 0x6df   : > { %v1685_v4 = vsel %vm1145_vm7, %v3876_v3, 0.0 }
 0x6e0   : > { %v3878_v7 = vpop.eup %3877  ;;  %1686 = vadd.xlane.f32.xlu0 %v1685_v4  ;;  %v3420_v4 = vld [vmem:[%s4109_s29 + $0x2] ss:$0 sm:$0xff] }
 0x6e1   : > { %v1688_v8 = vsel %vm1145_vm7, %v3878_v7, 0.0 }
 0x6e2   : > { %1689 = vadd.xlane.f32.xlu1 %v1688_v8 }
 0x76d   : > { %v1687_v9 = vpop.xlane.xlu0 %1686 }
 0x76e   : > { %3879 = vrcp.f32 %v1687_v9 }
 0x76f   : > { %v1690_v10 = vpop.xlane.xlu1 %1689 }
 0x770   : > { %3881 = vrcp.f32 %v1690_v10 }
 0x778   : > { %v3880_v11 = vpop.eup %3879 }
 0x779   : > { %v1693_v13 = vmul.f32 %v3880_v11, %v3876_v3 }
 0x77a   : > { %v3882_v14 = vpop.eup %3881 }
 0x77b   : > { %v1694_v16 = vmul.f32 %v3882_v14, %v3878_v7  ;;  %v1695_v17 = vpack.c.bf16 %v1693_v13, %v1693_v13 }
 0x77d   : > { %3661 = vmatmul.mubr.msk.bf16.vlgmr.msra.gmra.mrb[24].mxu0 %vm1145_vm7, %v1695_v17  ;;  %v1696_v20 = vpack.c.bf16 %v1694_v16, %v1694_v16 }
 0x77e   : > { %3671 = vmatpush3.bf16.msra.mxu0 %v1796_v19  ;;  %3672 = vmatprep.mubr.msk.bf16.mxu0 %vm3956_vm2, %v3955_v18 }
 0x77f   : > { %3667 = vmatmul.mubr.msk.bf16.vlgmr.msra.gmra.mrb[24].mxu1 %vm1145_vm7, %v1696_v20  ;;  %3682 = vmatprep.subr.bf16.mxu0 %v3955_v18 }
 0x780   : > { %3677 = vmatpush3.bf16.msra.mxu1 %v1843_v21  ;;  %3678 = vmatprep.mubr.msk.bf16.mxu1 %vm3956_vm2, %v3955_v18 }
 0x781   : > { %3690 = vmatprep.subr.bf16.mxu1 %v3955_v18 }
 0x787   : > { %3679 = vmatmul.mubr.msk.bf16.vlgmr.msra.gmra.mrb[28].mxu1 %vm1145_vm7, %v1371_v6 }
 0x788   : > { %3691 = vmatpush3.bf16.msra.mxu1 %v3841_v22  ;;  %3694 = vmatprep.mubr.msk.bf16.mxu1 %vm3956_vm2, %v3955_v18 }
 0x789   : > { %3692 = vmatprep.subr.bf16.mxu1 %v3955_v18 }
 0x78c   : > { %3693 = vmatpush3.bf16.msra.mxu1 %v3842_v23 }
 0x78d   : > { %3706 = vmatprep.subr.bf16.mxu1 %v3955_v18 }
 0x78f   : > { %3695 = vmatmul.mubr.msk.bf16.vlgmr.msra.gmra.mrb[32].mxu1 %vm885_vm1, %v4192_v48 }
 0x790   : > { %3708 = vmatprep.mubr.msk.bf16.mxu1 %vm3956_vm2, %v3955_v18 }
 0x850   : > { %v1737_v2 = vpop.f32.mrb[24].mxu0 }
 0x851   : > { %v3662_v5 = vpop.f32.mrb[25].mxu0 }
 0x852   : > { %v1740_v6 = vpop.f32.mrb[26].mxu0  ;;  %v1783_v24 = vpop.f32.mrb[24].mxu1 }
 0x853   : > { %v1789_v27 = vpack.c.bf16 %v1783_v24, %v1737_v2  ;;  %v3663_v28 = vpop.f32.mrb[27].mxu0  ;;  %v3668_v30 = vpop.f32.mrb[25].mxu1 }
 0x854   : > { %v1786_v31 = vpop.f32.mrb[26].mxu1 }
 0x855   : > { %v3669_v32 = vpop.f32.mrb[27].mxu1  ;;  %3673 = vmatmul.mubr.msk.bf16.vlgmr.msra.gmra.mrb[28].mxu0 %vm1145_vm7, %v1789_v27 }
 0x856   : > { %3683 = vmatpush3.bf16.msra.mxu0 %v3843_v26  ;;  %3686 = vmatprep.mubr.msk.bf16.mxu0 %vm3956_vm2, %v3955_v18 }
 0x857   : > { %3684 = vmatprep.subr.bf16.mxu0 %v3955_v18 }
 0x85a   : > { %3685 = vmatpush3.bf16.msra.mxu0 %v3844_v33  ;;  %v1879_v34 = vpop.f32.mrb[28].mxu1 }
 0x85b   : > { %v3680_v36 = vpop.f32.mrb[29].mxu1  ;;  %3698 = vmatprep.subr.bf16.mxu0 %v3955_v18 }
 0x85c   : > { %v1882_v37 = vpop.f32.mrb[30].mxu1 }
 0x85d   : > { %v3681_v38 = vpop.f32.mrb[31].mxu1  ;;  %3687 = vmatmul.mubr.msk.bf16.vlgmr.msra.gmra.mrb[32].mxu0 %vm885_vm1, %v4192_v48 }
 0x85e   : > { %3699 = vmatpush3.bf16.msra.mxu0 %v3845_v35  ;;  %3702 = vmatprep.mubr.msk.bf16.mxu0 %vm3956_vm2, %v3955_v18 }
 0x85f   : > { %3700 = vmatprep.subr.bf16.mxu0 %v3955_v18 }
 0x862   : > { %3701 = vmatpush3.bf16.msra.mxu0 %v3846_v39  ;;  %v2011_v41 = vpop.f32.mrb[32].mxu1 }
 0x863   : > { %v2012_v42 = vadd.f32 %v3411_v40, %v2011_v41  ;;  %v3696_v43 = vpop.f32.mrb[33].mxu1  ;;  %3712 = vmatprep.subr.bf16.mxu0 %v3955_v18 }
 0x864   : > { %v2014_v44 = vpop.f32.mrb[34].mxu1 }
 0x865   : > { %v2086_v45 = vpack.c.bf16 %v2012_v42, %v2012_v42  ;;  %v2015_v46 = vadd.f32 %v3411_v40, %v2014_v44  ;;  %v3697_v47 = vpop.f32.mrb[35].mxu1  ;;  %3703 = vmatmul.mubr.msk.bf16.vlgmr.msra.gmra.mrb[36].mxu0 %vm885_vm1, %v4192_v48  ;;  %v3428_v44 = vld [vmem:[%s4119_s18 + $0x8] sm:$0xf] }
 0x866   : > { %3714 = vmatprep.mubr.msk.bf16.mxu0 %vm3956_vm2, %v3955_v18 }
 0x867   : > { %v2094_v49 = vsel %vm1145_vm7, %v2086_v45, 0  ;;  %v2087_v50 = vpack.c.bf16 %v2015_v46, %v2015_v46 }
 0x868   : > { %3707 = vmatpush3.bf16.xpose.msra.mxu1 %v2094_v49 }
 0x869   : > { %v2140_v51 = vsel %vm1145_vm7, %v2087_v50, 0  ;;  %3718 = vmatprep.subr.bf16.mxu1 %v3955_v18  ;;  %v2309_v50 = vsel %vm1281_vm8, %v3428_v44, 0 }
 0x86b   : > { %3713 = vmatpush3.bf16.xpose.msra.mxu0 %v2140_v51  ;;  %v3847_v51 = vld [vmem:[%s4602_s28 + $0x30] sm:$0xff]  }
 0x86c   : > { %3724 = vmatprep.subr.bf16.mxu0 %v3955_v18 }
 0x928   : > { %v1832_v52 = vpop.f32.mrb[28].mxu0 }
 0x929   : > { %v4353_v53 = vadd.f32 %v1879_v34, %v1832_v52  ;;  %v3674_v54 = vpop.f32.mrb[29].mxu0 }
 0x92a   : > { %v1835_v55 = vpop.f32.mrb[30].mxu0  ;;  %v3848_v54 = vld [vmem:[%s4602_s28 + $0x38] sm:$0xff]  }
 0x92b   : > { %v4355_v56 = vadd.f32 %v1882_v37, %v1835_v55  ;;  %v3675_v57 = vpop.f32.mrb[31].mxu0  ;;  %v3849_v55 = vld [vmem:[%s4104_s26 + $0x30] sm:$0xff]  }
 0x92c   : > { %v3850_v57 = vld [vmem:[%s4104_s26 + $0x38] sm:$0xff]  }
 0x930   : > { %v1945_v59 = vpop.f32.mrb[32].mxu0 }
 0x931   : > { %v1946_v60 = vadd.f32 %v3402_v58, %v1945_v59  ;;  %v3688_v61 = vpop.f32.mrb[33].mxu0 }
 0x932   : > { %v1948_v62 = vpop.f32.mrb[34].mxu0 }
 0x933   : > { %v2084_v63 = vpack.c.bf16 %v1946_v60, %v1946_v60  ;;  %v1949_v0 = vadd.f32 %v3402_v58, %v1948_v62  ;;  %v3689_v1 = vpop.f32.mrb[35].mxu0  ;;  %v3851_v62 = vld [vmem:[%s4603_s5 + $0x30] sm:$0xff]  }
 0x935   : > { %v2085_v3 = vpack.c.bf16 %v1949_v0, %v1949_v0  ;;  %3709 = vmatmul.mubr.msk.bf16.vlgmr.msra.gmra.mrb[36].mxu1 %vm1145_vm7, %v2084_v63 }
 0x936   : > { %3720 = vmatprep.mubr.msk.bf16.mxu1 %vm3956_vm2, %v3955_v18 }
 0x937   : > { %3715 = vmatmul.mubr.msk.bf16.vlgmr.msra.gmra.mrb[40].mxu0 %vm1145_vm7, %v2085_v3 }
 0x938   : > { %v2077_v7 = vpop.f32.mrb[36].mxu0  ;;  %3726 = vmatprep.mubr.msk.bf16.mxu0 %vm3956_vm2, %v3955_v18 }
 0x939   : > { %v2078_v8 = vadd.f32 %v3420_v4, %v2077_v7  ;;  %v3704_v9 = vpop.f32.mrb[37].mxu0  ;;  %v3852_v7 = vld [vmem:[%s4603_s5 + $0x38] sm:$0xff]  }
 0x93a   : > { %v2080_v10 = vpop.f32.mrb[38].mxu0 }
 0x93b   : > { %v2088_v11 = vpack.c.bf16 %v2078_v8, %v2078_v8  ;;  %v2081_v12 = vadd.f32 %v3420_v4, %v2080_v10  ;;  %v3705_v13 = vpop.f32.mrb[39].mxu0 }
 0x93d   : > { %v2214_v14 = vsel %vm1281_vm8, %v2088_v11, 0  ;;  %v2089_v15 = vpack.c.bf16 %v2081_v12, %v2081_v12 }
 0x93e   : > { %3719 = vmatpush3.bf16.msra.mxu1 %v2214_v14 }
 0x93f   : > { %v2260_v16 = vsel %vm1281_vm8, %v2089_v15, 0  ;;  %3730 = vmatprep.subr.bf16.mxu1 %v3955_v18 }
 0x940   : > { %3725 = vmatpush3.bf16.msra.mxu0 %v2260_v16 }
 0x941   : > { %3736 = vmatprep.subr.bf16.mxu0 %v3955_v18 }
 0xa08   : > { %v2130_v17 = vpop.f32.mrb[36].mxu1 }
 0xa09   : > { %v2182_v19 = vmul.f32 0.35355338, %v2130_v17  ;;  %v3710_v20 = vpop.f32.mrb[37].mxu1 }
 0xa0a   : > { %v2133_v21 = vpop.f32.mrb[38].mxu1  ;;  %v2176_v22 = vpop.f32.mrb[40].mxu0 }
 0xa0b   : > { %v2183_v23 = vmul.f32 0.35355338, %v2176_v22  ;;  %v3711_v2 = vpop.f32.mrb[39].mxu1  ;;  %v3716_v5 = vpop.f32.mrb[41].mxu0  ;;  %v2184_v6 = vadd.f32 %v2182_v19, %v4234_v25 }
 0xa0c   : > { %v2179_v24 = vpop.f32.mrb[42].mxu0 }
 0xa0d   : > { %v3717_v26 = vpop.f32.mrb[43].mxu0  ;;  %v2186_v27 = vsel %vm1145_vm7, %v2184_v6, -inf  ;;  %v2185_v28 = vadd.f32 %v2183_v23, %v4236_v29 }
 0xa0e   : > { %2187 = vmax.xlane.f32.xlu0 %v2186_v27 }
 0xa0f   : > { %v2189_v30 = vsel %vm1145_vm7, %v2185_v28, -inf }
 0xa10   : > { %2190 = vmax.xlane.f32.xlu1 %v2189_v30  ;;  %v3435_v30 = vld [vmem:[%s4606_s21 + $0x3] ss:$0 sm:$0xff] }
 0xa9b   : > { %v2188_v31 = vpop.xlane.xlu0 %2187 }
 0xa9c   : > { %v2192_v32 = vsub.f32 %v2184_v6, %v2188_v31  ;;  %v3453_v6 = vld [vmem:[%s4109_s29 + $0x3] ss:$0 sm:$0xff]  ;;  %s4609_s29 = scalar_lea.vmem %s4555_s9, %s4077_s23 }
 0xa9d   : > { %v2191_v33 = vpop.xlane.xlu1 %2190 }
 0xa9e   : > { %v2194_v34 = vmul.f32 1.442695, %v2192_v32  ;;  %v2193_v35 = vsub.f32 %v2185_v28, %v2191_v33 }
 0xaa0   : > { %3883 = vpow2.f32 %v2194_v34  ;;  %v2196_v36 = vmul.f32 1.442695, %v2193_v35 }
 0xaa2   : > { %3885 = vpow2.f32 %v2196_v36 }
 0xaaa   : > { %v3884_v37 = vpop.eup %3883 }
 0xaab   : > { %v2198_v38 = vsel %vm1145_vm7, %v3884_v37, 0.0 }
 0xaac   : > { %v3886_v39 = vpop.eup %3885  ;;  %2199 = vadd.xlane.f32.xlu0 %v2198_v38 }
 0xaad   : > { %v2201_v40 = vsel %vm1145_vm7, %v3886_v39, 0.0 }
 0xaae   : > { %2202 = vadd.xlane.f32.xlu1 %v2201_v40 }
 0xb39   : > { %v2200_v41 = vpop.xlane.xlu0 %2199 }
 0xb3a   : > { %3887 = vrcp.f32 %v2200_v41 }
 0xb3b   : > { %v2203_v42 = vpop.xlane.xlu1 %2202 }
 0xb3c   : > { %3889 = vrcp.f32 %v2203_v42 }
 0xb44   : > { %v3888_v43 = vpop.eup %3887 }
 0xb45   : > { %v2206_v45 = vmul.f32 %v3888_v43, %v3884_v37 }
 0xb46   : > { %v3890_v46 = vpop.eup %3889 }
 0xb47   : > { %v2207_v47 = vmul.f32 %v3890_v46, %v3886_v39  ;;  %v2208_v49 = vpack.c.bf16 %v2206_v45, %v2206_v45 }
 0xb49   : > { %3721 = vmatmul.mubr.msk.bf16.vlgmr.msra.gmra.mrb[40].mxu1 %vm1145_vm7, %v2208_v49  ;;  %v2209_v52 = vpack.c.bf16 %v2207_v47, %v2207_v47 }
 0xb4a   : > { %3731 = vmatpush3.bf16.msra.mxu1 %v2309_v50  ;;  %3732 = vmatprep.mubr.msk.bf16.mxu1 %vm3956_vm2, %v3955_v18 }
 0xb4b   : > { %3727 = vmatmul.mubr.msk.bf16.vlgmr.msra.gmra.mrb[44].mxu0 %vm1145_vm7, %v2209_v52  ;;  %3744 = vmatprep.subr.bf16.mxu1 %v3955_v18 }
 0xb4c   : > { %3737 = vmatpush3.bf16.msra.mxu0 %v3847_v51  ;;  %3740 = vmatprep.mubr.msk.bf16.mxu0 %vm3956_vm2, %v3955_v18 }
 0xb4d   : > { %3738 = vmatprep.subr.bf16.mxu0 %v3955_v18 }
 0xb50   : > { %3739 = vmatpush3.bf16.msra.mxu0 %v3848_v54 }
 0xb51   : > { %3752 = vmatprep.subr.bf16.mxu0 %v3955_v18 }
 0xb53   : > { %3741 = vmatmul.mubr.msk.bf16.vlgmr.msra.gmra.mrb[48].mxu0 %vm885_vm1, %v4192_v48 }
 0xb54   : > { %3753 = vmatpush3.bf16.msra.mxu0 %v3849_v55  ;;  %3756 = vmatprep.mubr.msk.bf16.mxu0 %vm3956_vm2, %v3955_v18 }
 0xb55   : > { %3754 = vmatprep.subr.bf16.mxu0 %v3955_v18 }
 0xb58   : > { %3755 = vmatpush3.bf16.msra.mxu0 %v3850_v57 }
 0xb59   : > { %3766 = vmatprep.subr.bf16.mxu0 %v3955_v18 }
 0xb5b   : > { %3757 = vmatmul.mubr.msk.bf16.vlgmr.msra.gmra.mrb[52].mxu0 %vm885_vm1, %v4192_v48 }
 0xb5c   : > { %3768 = vmatprep.mubr.msk.bf16.mxu0 %vm3956_vm2, %v3955_v18 }
 0xc1c   : > { %v2250_v58 = vpop.f32.mrb[40].mxu1 }
 0xc1d   : > { %v3722_v59 = vpop.f32.mrb[41].mxu1 }
 0xc1e   : > { %v2253_v60 = vpop.f32.mrb[42].mxu1  ;;  %v2296_v61 = vpop.f32.mrb[44].mxu0 }
 0xc1f   : > { %v2302_v63 = vpack.c.bf16 %v2296_v61, %v2250_v58  ;;  %v3723_v0 = vpop.f32.mrb[43].mxu1  ;;  %v3728_v1 = vpop.f32.mrb[45].mxu0 }
 0xc20   : > { %v2299_v3 = vpop.f32.mrb[46].mxu0 }
 0xc21   : > { %v3729_v4 = vpop.f32.mrb[47].mxu0  ;;  %3733 = vmatmul.mubr.msk.bf16.vlgmr.msra.gmra.mrb[44].mxu1 %vm1145_vm7, %v2302_v63 }
 0xc22   : > { %3745 = vmatpush3.bf16.msra.mxu1 %v3851_v62  ;;  %3748 = vmatprep.mubr.msk.bf16.mxu1 %vm3956_vm2, %v3955_v18 }
 0xc23   : > { %3746 = vmatprep.subr.bf16.mxu1 %v3955_v18 }
 0xc26   : > { %v2413_v8 = vpop.f32.mrb[48].mxu0  ;;  %3747 = vmatpush3.bf16.msra.mxu1 %v3852_v7 }
 0xc27   : > { %v3742_v9 = vpop.f32.mrb[49].mxu0  ;;  %3760 = vmatprep.subr.bf16.mxu1 %v3955_v18  ;;  %v2414_v33 = vadd.f32 %v3435_v30, %v2413_v8 }
 0xc28   : > { %v2416_v10 = vpop.f32.mrb[50].mxu0  ;;  %v3461_v9 = vld [vmem:[%s4119_s18 + $0xc] sm:$0xf] }
 0xc29   : > { %v3743_v11 = vpop.f32.mrb[51].mxu0  ;;  %3749 = vmatmul.mubr.msk.bf16.vlgmr.msra.gmra.mrb[48].mxu1 %vm885_vm1, %v4192_v48  ;;  %v3444_v48 = vld [vmem:[%s4099_s22 + $0x3] ss:$0 sm:$0xff]  ;;  %v2417_v35 = vadd.f32 %v3435_v30, %v2416_v10  ;;  %v2552_v37 = vpack.c.bf16 %v2414_v33, %v2414_v33 }
 0xc2a   : > { %3762 = vmatprep.mubr.msk.bf16.mxu1 %vm3956_vm2, %v3955_v18 }
 0xc2b   : > { %v2553_v39 = vpack.c.bf16 %v2417_v35, %v2417_v35 }
 0xc2e   : > { %v2545_v12 = vpop.f32.mrb[52].mxu0 }
 0xc2f   : > { %v3758_v13 = vpop.f32.mrb[53].mxu0  ;;  %v2546_v31 = vadd.f32 %v3453_v6, %v2545_v12 }
 0xc30   : > { %v2548_v14 = vpop.f32.mrb[54].mxu0 }
 0xc31   : > { %v3759_v15 = vpop.f32.mrb[55].mxu0  ;;  %v2549_v34 = vadd.f32 %v3453_v6, %v2548_v14  ;;  %v2556_v36 = vpack.c.bf16 %v2546_v31, %v2546_v31  ;;  %v2777_v14 = vsel %vm1281_vm8, %v3461_v9, 0  ;;  %v3907_v31 = vld [vmem:[#allocation2] sm:$0xff] }
 0xc33   : > { %v2557_v38 = vpack.c.bf16 %v2549_v34, %v2549_v34  ;;  %v2682_v40 = vsel %vm1281_vm8, %v2556_v36, 0 }
 0xc35   : > { %v2728_v41 = vsel %vm1281_vm8, %v2557_v38, 0 }
 0xcf4   : > { %v2345_v16 = vpop.f32.mrb[44].mxu1 }
 0xcf5   : > { %v4412_v17 = vadd.f32 %v2345_v16, %v4353_v53  ;;  %v3734_v19 = vpop.f32.mrb[45].mxu1 }
 0xcf6   : > { %v2348_v20 = vpop.f32.mrb[46].mxu1 }
 0xcf7   : > { %v4415_v21 = vadd.f32 %v2348_v20, %v4355_v56  ;;  %v3735_v22 = vpop.f32.mrb[47].mxu1 }
 0xcfc   : > { %v2479_v23 = vpop.f32.mrb[48].mxu1 }
 0xcfd   : > { %v2480_v2 = vadd.f32 %v3444_v48, %v2479_v23  ;;  %v3750_v5 = vpop.f32.mrb[49].mxu1 }
 0xcfe   : > { %v2482_v24 = vpop.f32.mrb[50].mxu1 }
 0xcff   : > { %v2554_v26 = vpack.c.bf16 %v2480_v2, %v2480_v2  ;;  %v2483_v27 = vadd.f32 %v3444_v48, %v2482_v24  ;;  %v3751_v28 = vpop.f32.mrb[51].mxu1 }
 0xd00   : > { %v3463_v28 = vld [vmem:[%s4609_s29] ss:$0 sm:$0xff] }
 0xd01   : > { %v2562_v53 = vsel %vm1145_vm7, %v2554_v26, 0  ;;  %v2555_v32 = vpack.c.bf16 %v2483_v27, %v2483_v27 }
 0xd02   : > { %3761 = vmatpush3.bf16.xpose.msra.mxu1 %v2562_v53 }
 0xd03   : > { %v2608_v56 = vsel %vm1145_vm7, %v2555_v32, 0  ;;  %3772 = vmatprep.subr.bf16.mxu1 %v3955_v18 }
 0xd04   : > { %3767 = vmatpush3.bf16.xpose.msra.mxu0 %v2608_v56  ;;  %v3908_v56 = vld [vmem:[#allocation2 + $0x8] sm:$0xff] }
 0xd05   : > { %3778 = vmatprep.subr.bf16.mxu0 %v3955_v18 }
 0xd09   : > { %3763 = vmatmul.mubr.msk.bf16.vlgmr.msra.gmra.mrb[52].mxu1 %vm1145_vm7, %v2552_v37 }
 0xd0a   : > { %3773 = vmatpush3.bf16.msra.mxu1 %v2682_v40  ;;  %3774 = vmatprep.mubr.msk.bf16.mxu1 %vm3956_vm2, %v3955_v18 }
 0xd0b   : > { %3769 = vmatmul.mubr.msk.bf16.vlgmr.msra.gmra.mrb[56].mxu0 %vm1145_vm7, %v2553_v39  ;;  %3784 = vmatprep.subr.bf16.mxu1 %v3955_v18 }
 0xd0c   : > { %3779 = vmatpush3.bf16.msra.mxu0 %v2728_v41  ;;  %3780 = vmatprep.mubr.msk.bf16.mxu0 %vm3956_vm2, %v3955_v18 }
 0xd0d   : > { %3790 = vmatprep.subr.bf16.mxu0 %v3955_v18 }
 0xddc   : > { %v2598_v42 = vpop.f32.mrb[52].mxu1 }
 0xddd   : > { %v2650_v43 = vmul.f32 0.35355338, %v2598_v42  ;;  %v3764_v44 = vpop.f32.mrb[53].mxu1 }
 0xdde   : > { %v2601_v45 = vpop.f32.mrb[54].mxu1  ;;  %v2644_v46 = vpop.f32.mrb[56].mxu0 }
 0xddf   : > { %v2651_v47 = vmul.f32 0.35355338, %v2644_v46  ;;  %v3765_v49 = vpop.f32.mrb[55].mxu1  ;;  %v3770_v50 = vpop.f32.mrb[57].mxu0  ;;  %v2652_v51 = vadd.f32 %v2650_v43, %v4234_v25 }
 0xde0   : > { %v2647_v52 = vpop.f32.mrb[58].mxu0  ;;  %v3854_v49 = vld [vmem:[%s4132_s6 + $0x8] sm:$0xff]   ;;  %v3855_v50 = vld [vmem:[%s4142_s8] sm:$0xff]  }
 0xde1   : > { %v3771_v54 = vpop.f32.mrb[59].mxu0  ;;  %v2654_v55 = vsel %vm1145_vm7, %v2652_v51, -inf  ;;  %v2653_v57 = vadd.f32 %v2651_v47, %v4236_v29  ;;  %v3853_v47 = vld [vmem:[%s4132_s6] sm:$0xff]  }
 0xde2   : > { %2655 = vmax.xlane.f32.xlu0 %v2654_v55 }
 0xde3   : > { %v2657_v58 = vsel %vm1145_vm7, %v2653_v57, -inf }
 0xde4   : > { %2658 = vmax.xlane.f32.xlu1 %v2657_v58 }
 0xe6f   : > { %v2656_v59 = vpop.xlane.xlu0 %2655 }
 0xe70   : > { %v2660_v60 = vsub.f32 %v2652_v51, %v2656_v59  ;;  %v3856_v51 = vld [vmem:[%s4142_s8 + $0x8] sm:$0xff]  }
 0xe71   : > { %v2659_v61 = vpop.xlane.xlu1 %2658 }
 0xe72   : > { %v2662_v62 = vmul.f32 1.442695, %v2660_v60  ;;  %v2661_v63 = vsub.f32 %v2653_v57, %v2659_v61 }
 0xe74   : > { %3891 = vpow2.f32 %v2662_v62  ;;  %v2664_v0 = vmul.f32 1.442695, %v2661_v63 }
 0xe76   : > { %3893 = vpow2.f32 %v2664_v0 }
 0xe7e   : > { %v3892_v25 = vpop.eup %3891 }
 0xe7f   : > { %v2666_v1 = vsel %vm1145_vm7, %v3892_v25, 0.0 }
 0xe80   : > { %v3894_v3 = vpop.eup %3893  ;;  %2667 = vadd.xlane.f32.xlu0 %v2666_v1 }
 0xe81   : > { %v2669_v29 = vsel %vm1145_vm7, %v3894_v3, 0.0 }
 0xe82   : > { %2670 = vadd.xlane.f32.xlu1 %v2669_v29 }
 0xf0d   : > { %v2668_v4 = vpop.xlane.xlu0 %2667 }
 0xf0e   : > { %3895 = vrcp.f32 %v2668_v4 }
 0xf0f   : > { %v2671_v7 = vpop.xlane.xlu1 %2670 }
 0xf10   : > { %3897 = vrcp.f32 %v2671_v7  ;;  %v3464_v7 = vld [vmem:[%s861_s2] ss:$0 sm:$0xff] }
 0xf18   : > { %v3896_v8 = vpop.eup %3895 }
 0xf19   : > { %v2674_v10 = vmul.f32 %v3896_v8, %v3892_v25 }
 0xf1a   : > { %v3898_v11 = vpop.eup %3897 }
 0xf1b   : > { %v2675_v12 = vmul.f32 %v3898_v11, %v3894_v3  ;;  %v2676_v13 = vpack.c.bf16 %v2674_v10, %v2674_v10 }
 0xf1d   : > { %3775 = vmatmul.mubr.msk.bf16.vlgmr.msra.gmra.mrb[56].mxu1 %vm1145_vm7, %v2676_v13  ;;  %v2677_v15 = vpack.c.bf16 %v2675_v12, %v2675_v12  ;;  %v3465_v13 = vld [vmem:[%s864_s24] ss:$0 sm:$0xff] }
 0xf1e   : > { %3785 = vmatpush3.bf16.msra.mxu1 %v2777_v14  ;;  %3786 = vmatprep.mubr.msk.bf16.mxu1 %vm3956_vm2, %v3955_v18 }
 0xf1f   : > { %3781 = vmatmul.mubr.msk.bf16.vlgmr.msra.gmra.mrb[60].mxu0 %vm1145_vm7, %v2677_v15  ;;  %3798 = vmatprep.subr.bf16.mxu1 %v3955_v18 }
 0xf20   : > { %3794 = vmatprep.mubr.msk.bf16.mxu0 %vm3956_vm2, %v3955_v18  ;;  %3791 = vmatpush3.bf16.msra.mxu0 %v3853_v47 }
 0xf21   : > { %3792 = vmatprep.subr.bf16.mxu0 %v3955_v18 }
 0xf24   : > { %3793 = vmatpush3.bf16.msra.mxu0 %v3854_v49 }
 0xff0   : > { %v2718_v16 = vpop.f32.mrb[56].mxu1 }
 0xff1   : > { %v3776_v19 = vpop.f32.mrb[57].mxu1 }
 0xff2   : > { %v2721_v20 = vpop.f32.mrb[58].mxu1  ;;  %v2764_v22 = vpop.f32.mrb[60].mxu0 }
 0xff3   : > { %v2770_v48 = vpack.c.bf16 %v2764_v22, %v2718_v16  ;;  %v3777_v23 = vpop.f32.mrb[59].mxu1  ;;  %v3782_v2 = vpop.f32.mrb[61].mxu0  ;;  %v3857_v20 = vld [vmem:[%s4142_s8 + $0x10] sm:$0xff]   ;;  %v3858_v22 = vld [vmem:[%s4142_s8 + $0x18] sm:$0xff]   ;;  %s4611_s8 = sld [smem:[#allocation6_spill]] }
 0xff4   : > { %v2767_v5 = vpop.f32.mrb[62].mxu0 }
 0xff5   : > { %v3783_v6 = vpop.f32.mrb[63].mxu0  ;;  %3787 = vmatmul.mubr.msk.bf16.vlgmr.msra.gmra.mrb[60].mxu1 %vm1145_vm7, %v2770_v48  ;;  %v3466_v48 = vld [vmem:[%s4610_s0] ss:$0 sm:$0xff] }
 0xff6   : > { %3806 = vmatprep.mubr.msk.bf16.mxu1 %vm3956_vm2, %v3955_v18  ;;  %3799 = vmatpush3.bf16.msra.mxu1 %v3855_v50 }
 0xff7   : > { %3800 = vmatprep.subr.bf16.mxu1 %v3955_v18 }
 0xff9   : > { %p3476_p5 = scmp.ne.s32.totalorder %s4611_s8, 1 }
 0xffa   : > { %3801 = vmatpush3.bf16.msra.mxu1 %v3856_v51  ;;  %s4612_s20 = sld [smem:[#allocation19_spill]] (!%p3476_p5)  ;;  %s4613_s3 = sld [smem:[#allocation20_spill]] (!%p3476_p5) }
 0xffb   : > { %3802 = vmatprep.subr.bf16.mxu1 %v3955_v18 }
 0xffe   : > { %3803 = vmatpush3.bf16.msra.mxu1 %v3857_v20 }
 0xfff   : > { %3804 = vmatprep.subr.bf16.mxu1 %v3955_v18  ;;  %v3470_v18 = vld [vmem:[%s858_s25] ss:$0 sm:$0xff] }
0x1002   : > { %3805 = vmatpush3.bf16.msra.mxu1 %v3858_v22 }
0x10c8   : > { %v2813_v24 = vpop.f32.mrb[60].mxu1 }
0x10c9   : > { %v2820_v26 = vadd.f32 %v2813_v24, %v4412_v17  ;;  %v3788_v27 = vpop.f32.mrb[61].mxu1 }
0x10ca   : > { %v2816_v30 = vpop.f32.mrb[62].mxu1 }
0x10cb   : > { %v2822_v53 = vadd.f32 %v3907_v31, %v2820_v26  ;;  %v2821_v32 = vadd.f32 %v2816_v30, %v4415_v21  ;;  %v3789_v33 = vpop.f32.mrb[63].mxu1 }
0x10cd   : > { %v4459_v34 = vadd.f32 %v3463_v28, %v2822_v53  ;;  %v2823_v35 = vadd.f32 %v3908_v56, %v2821_v32 }
0x10cf   : > { %v4461_v36 = vadd.f32 %v3463_v28, %v2823_v35  ;;  %v2835_v17 = vsel %vm885_vm1, %v4459_v34, 0.0 }
0x10d0   : > { %2836 = vadd.xlane.f32.xlu0 %v2835_v17 }
0x10d1   : > { %v2838_v37 = vsel %vm885_vm1, %v4461_v36, 0.0 }
0x10d2   : > { %2839 = vadd.xlane.f32.xlu1 %v2838_v37 }
0x115d   : > { %v2837_v38 = vpop.xlane.xlu0 %2836 }
0x115e   : > { %v2841_v39 = vmul.f32 0.03125, %v2837_v38 }
0x115f   : > { %v2840_v21 = vpop.xlane.xlu1 %2839 }
0x1160   : > { %v2843_v40 = vsub.f32 %v4459_v34, %v2841_v39  ;;  %v2842_v41 = vmul.f32 0.03125, %v2840_v21 }
0x1162   : > { %v2844_v42 = vsub.f32 %v4461_v36, %v2842_v41  ;;  %v2845_v43 = vmul.f32 %v2843_v40, %v2843_v40  ;;  %v2879_v9 = vmul.f32 %v3464_v7, %v2843_v40 }
0x1164   : > { %v2847_v44 = vsel %vm885_vm1, %v2845_v43, 0.0  ;;  %v2846_v45 = vmul.f32 %v2844_v42, %v2844_v42  ;;  %v2880_v10 = vmul.f32 %v3464_v7, %v2844_v42 }
0x1165   : > { %2848 = vadd.xlane.f32.xlu0 %v2847_v44 }
0x1166   : > { %v2850_v46 = vsel %vm885_vm1, %v2846_v45, 0.0 }
0x1167   : > { %2851 = vadd.xlane.f32.xlu1 %v2850_v46 }
0x11f2   : > { %v2849_v52 = vpop.xlane.xlu0 %2848 }
0x11f3   : > { %v2853_v54 = vmul.f32 0.032258064, %v2849_v52 }
0x11f4   : > { %v2852_v55 = vpop.xlane.xlu1 %2851 }
0x11f5   : > { %3899 = vrsqrt.f32 %v2853_v54  ;;  %v2854_v57 = vmul.f32 0.032258064, %v2852_v55  ;;  %vm2857_vm11 = vcmp.eq.f32.partialorder %v2853_v54, inf  ;;  %v2860_v60 = vand.u32 2147483648, %v2853_v54 }
0x11f6   : > { %vm2859_vm12 = vcmp.eq.f32.partialorder %v2853_v54, 0.0 }
0x11f7   : > { %3901 = vrsqrt.f32 %v2854_v57  ;;  %vm2864_vm13 = vcmp.eq.f32.partialorder %v2854_v57, inf  ;;  %v2867_v1 = vand.u32 2147483648, %v2854_v57  ;;  %vm2866_vm14 = vcmp.eq.f32.partialorder %v2854_v57, 0.0 }
0x11ff   : > { %v3900_v58 = vpop.eup %3899 }
0x1200   : > { %v2856_v59 = vmul.f32 %v3900_v58, %v2853_v54 }
0x1201   : > { %v3902_v61 = vpop.eup %3901 }
0x1202   : > { %v2858_v62 = vsel %vm2857_vm11, %v2853_v54, %v2856_v59  ;;  %v2863_v0 = vmul.f32 %v3902_v61, %v2854_v57 }
0x1203   : > { %v2861_v63 = vsel %vm2859_vm12, %v2860_v60, %v2858_v62 }
0x1204   : > { %v2869_v25 = vadd.f32 1e-08, %v2861_v63  ;;  %v2865_v3 = vsel %vm2864_vm13, %v2854_v57, %v2863_v0 }
0x1205   : > { %v2868_v29 = vsel %vm2866_vm14, %v2867_v1, %v2865_v3  ;;  %v3477_v1 = vld [vmem:[%s4612_s20] ss:$0 sm:$0xff] (!%p3476_p5) }
0x1206   : > { %3903 = vrcp.f32 %v2869_v25  ;;  %v2870_v4 = vadd.f32 1e-08, %v2868_v29 }
0x1208   : > { %3905 = vrcp.f32 %v2870_v4  ;;  %v3478_v4 = vld [vmem:[%s4613_s3] ss:$0 sm:$0xff] (!%p3476_p5) }
0x1210   : > { %v3904_v8 = vpop.eup %3903 }
0x1211   : > { %v2881_v11 = vmul.f32 %v3904_v8, %v2879_v9 }
0x1212   : > { %v3906_v12 = vpop.eup %3905 }
0x1213   : > { %v2882_v14 = vmul.f32 %v3906_v12, %v2880_v10  ;;  %v2889_v15 = vadd.f32 %v3465_v13, %v2881_v11 }
0x1215   : > { %v2890_v16 = vadd.f32 %v3465_v13, %v2882_v14 }
0x1217   : > { %v2891_v19 = vpack.c.bf16 %v2890_v16, %v2889_v15 }
0x1219   : > { %3795 = vmatmul.mubr.msk.bf16.vlgmr.msra.gmra.mrb[64].mxu0 %vm885_vm1, %v2891_v19 }
0x12ec   : > { %v2952_v23 = vpop.f32.mrb[64].mxu0 }
0x12ed   : > { %v2953_v2 = vadd.f32 %v3466_v48, %v2952_v23  ;;  %v3796_v5 = vpop.f32.mrb[65].mxu0 }
0x12ee   : > { %v2955_v6 = vpop.f32.mrb[66].mxu0 }
0x12ef   : > { %v2956_v24 = vadd.f32 %v3466_v48, %v2955_v6  ;;  %v3797_v26 = vpop.f32.mrb[67].mxu0  ;;  %v2959_v27 = vmax.f32 %v2953_v2, 0.0 }
0x12f1   : > { %v2960_v28 = vmax.f32 %v2956_v24, 0.0 }
0x12f3   : > { %v2961_v30 = vpack.c.bf16 %v2960_v28, %v2959_v27 }
0x12f5   : > { %3807 = vmatmul.mubr.msk.bf16.vlgmr.msra.gmra.mrb[64].mxu1 %vm3001_vm15, %v2961_v30 }
0x13c7   : > { %3051 = sbr.rel (%p3476_p5) target bundleno = 5400 (0x1518), region = 108 }
0x13c8   : > { %v3039_v31 = vpop.f32.mrb[64].mxu1 }
0x13c9   : > { %v3040_v53 = vadd.f32 %v3470_v18, %v3039_v31  ;;  %v3808_v32 = vpop.f32.mrb[65].mxu1 }
0x13ca   : > { %v3042_v33 = vpop.f32.mrb[66].mxu1 }
0x13cb   : > { %v3046_v56 = vadd.f32 %v3040_v53, %v4459_v34  ;;  %v3043_v35 = vadd.f32 %v3470_v18, %v3042_v33  ;;  %v3809_v17 = vpop.f32.mrb[67].mxu1 }
0x13cd   : > { %v3047_v37 = vadd.f32 %v3043_v35, %v4461_v36  ;;  %v3054_v38 = vsel (!%p3476_p5), %vm885_vm1, %v3046_v56, 0.0 }
0x13ce   : > { %3055 = vadd.xlane.f32.xlu0 %v3054_v38 }
0x13cf   : > { %v3057_v39 = vsel %vm885_vm1, %v3047_v37, 0.0 }
0x13d2   : > { %3058 = vadd.xlane.f32.xlu0 %v3057_v39 }
0x145b   : > { %v3056_v21 = vpop.xlane.xlu0 %3055 }
0x145c   : > { %v3060_v40 = vmul.f32 0.03125, %v3056_v21 }
0x145e   : > { %v3062_v41 = vsub.f32 %v3046_v56, %v3060_v40 }
0x145f   : > { %v3059_v42 = vpop.xlane.xlu0 %3058 }
0x1460   : > { %v3061_v43 = vmul.f32 0.03125, %v3059_v42  ;;  %v3064_v44 = vmul.f32 %v3062_v41, %v3062_v41  ;;  %v3098_v3 = vmul.f32 %v3477_v1, %v3062_v41 }
0x1462   : > { %v3063_v34 = vsub.f32 %v3047_v37, %v3061_v43  ;;  %v3066_v45 = vsel %vm885_vm1, %v3064_v44, 0.0 }
0x1463   : > { %3067 = vadd.xlane.f32.xlu1 %v3066_v45 }
0x1464   : > { %v3065_v36 = vmul.f32 %v3063_v34, %v3063_v34  ;;  %v3099_v8 = vmul.f32 %v3477_v1, %v3063_v34 }
0x1466   : > { %v3069_v46 = vsel %vm885_vm1, %v3065_v36, 0.0 }
0x1467   : > { %3070 = vadd.xlane.f32.xlu1 %v3069_v46 }
0x14f0   : > { %v3068_v47 = vpop.xlane.xlu1 %3067 }
0x14f1   : > { %v3072_v49 = vmul.f32 0.032258064, %v3068_v47 }
0x14f3   : > { %3909 = vrsqrt.f32 %v3072_v49  ;;  %vm3076_vm0 = vcmp.eq.f32.partialorder %v3072_v49, inf  ;;  %v3079_v55 = vand.u32 2147483648, %v3072_v49  ;;  %vm3078_vm2 = vcmp.eq.f32.partialorder %v3072_v49, 0.0 }
0x14f4   : > { %v3071_v50 = vpop.xlane.xlu1 %3070 }
0x14f5   : > { %v3073_v51 = vmul.f32 0.032258064, %v3071_v50 }
0x14f7   : > { %3911 = vrsqrt.f32 %v3073_v51  ;;  %vm3083_vm3 = vcmp.eq.f32.partialorder %v3073_v51, inf  ;;  %v3086_v62 = vand.u32 2147483648, %v3073_v51  ;;  %vm3085_vm4 = vcmp.eq.f32.partialorder %v3073_v51, 0.0 }
0x14fd   : > { %v3910_v52 = vpop.eup %3909 }
0x14fe   : > { %v3075_v54 = vmul.f32 %v3910_v52, %v3072_v49 }
0x1500   : > { %v3077_v57 = vsel %vm3076_vm0, %v3072_v49, %v3075_v54 }
0x1501   : > { %v3912_v58 = vpop.eup %3911  ;;  %v3080_v59 = vsel %vm3078_vm2, %v3079_v55, %v3077_v57 }
0x1502   : > { %v3088_v60 = vadd.f32 1e-08, %v3080_v59  ;;  %v3082_v61 = vmul.f32 %v3912_v58, %v3073_v51 }
0x1504   : > { %3913 = vrcp.f32 %v3088_v60  ;;  %v3084_v63 = vsel %vm3083_vm3, %v3073_v51, %v3082_v61 }
0x1505   : > { %v3087_v0 = vsel %vm3085_vm4, %v3086_v62, %v3084_v63 }
0x1506   : > { %v3089_v25 = vadd.f32 1e-08, %v3087_v0 }
0x1508   : > { %3915 = vrcp.f32 %v3089_v25 }
0x150e   : > { %v3914_v29 = vpop.eup %3913 }
0x150f   : > { %v3100_v7 = vmul.f32 %v3914_v29, %v3098_v3 }
0x1511   : > { %v3108_v9 = vadd.f32 %v3478_v4, %v3100_v7 }
0x1512   : > { %v3916_v10 = vpop.eup %3915 }
0x1513   : > { %3110 = vst.msk [vmem:[#allocation2] sm:$0xff] %vm885_vm1, %v3108_v9  ;;  %v3101_v11 = vmul.f32 %v3916_v10, %v3099_v8 }
0x1515   : > { %v3109_v12 = vadd.f32 %v3478_v4, %v3101_v11 }
0x1517   : > { %3111 = vst.msk [vmem:[#allocation2 + $0x8] sm:$0xff] %vm885_vm1, %v3109_v12 }
0x1518 PF: > { %s4614_s30 = sld [smem:[#allocation6_spill]] }
0x151e   : > { %p3479_p6 = scmp.ge.s32.totalorder %s4614_s30, 1 }
0x151f   : > { %3116 = vst.msk [vmem:[#allocation2] sm:$0xff] (!%p3479_p6), %vm885_vm1, %v3046_v56  ;;  %3117 = vst.msk [vmem:[#allocation2 + $0x8] sm:$0xff] (!%p3479_p6), %vm885_vm1, %v3047_v37 }
0x1520   : > { %3115 = sbr.rel (%p3479_p6) target bundleno = 5415 (0x1527), region = 112 }
0x1527 PF: > { %s4615_s22 = sld [smem:[#allocation6_spill]]  ;;  %s3957_s26 = smov [#allocation2]  }
0x1528   : > { %s3124_s29 = sshll.u32 %s3957_s26, 4  ;;  %s3125_s29 = int_to_ptr.vmem [resolvable:$true] %s3124_s29 }
0x1529   : > { %s3917_s6 = scalar_lea.vmem %s3125_s29, 256  ;;  %p3924_p11 = scmp.lt.s32.totalorder %s3125_s29, %s3125_s29 }
0x152a   : > { %p3918_p8 = scmp.ne.s32.totalorder %s3125_s29, %s3917_s6  ;;  %p3925_p12 = scmp.lt.s32.totalorder %s3917_s6, %s3917_s6 }
0x152c   : > { %p3926_p13 = por %p3925_p12, %p3924_p11 }
0x152d   : > { %p3814_p7 = scmp.eq.s32.totalorder %s4615_s22, 1 }
0x152f   : > { %p3919_p9 = pnand %p3918_p8, %p3814_p7 }
0x1531   : > { %p3920_p10 = pneg %p3919_p9 }
0x1533   : > { %p3927_p0 = pnand %p3926_p13, %p3920_p10 }
0x1535   : > { %3930 = shalt.err (!%p3927_p0)
}
0x1536   : > { %s4616_s5 = sld [smem:[#allocation21_spill]] }
0x153c   : > { %s3931_s2 = scalar_lea.hbm %s4616_s5, 256 }
0x153d   : > { %p3932_p1 = scmp.ne.s32.totalorder %s4616_s5, %s3931_s2  ;;  %p3937_p4 = scmp.lt.u32.totalorder %s3931_s2, %s4616_s5 }
0x153f   : > { %p3933_p2 = pnand %p3932_p1, %p3814_p7 }
0x1541   : > { %p3934_p3 = pneg %p3933_p2 }
0x1543   : > { %p3939_p5 = pnand %p3937_p4, %p3934_p3 }
0x1545   : > { %3942 = shalt.err (!%p3939_p5)
}
0x1546   : > { %s3958_s8 = smov 128   ;;  %s3959_s23 = smov 8  }
0x1547   : > { %3811 = dma.vmem_to_hbm [thread:$0]  (%p3814_p7), %s3125_s29, 256, %s4616_s5, [#allocation3], %s3958_s8, %s3958_s8, %s3959_s23  }
0x1548   : > { %3948 = dma.done.wait (%p3814_p7), [#allocation3], 256  }
0x1549   : > { %3950 = vsyncadd (%p3814_p7), [#allocation3], 4294967040 }
0x154a PF: > { %s4617_s27 = sld [smem:[#allocation5_spill]] }
0x1550   : > { %s31_s1 = sadd.s32 1, %s4617_s27  }
0x1551   : > { %p28_p6 = scmp.ge.s32.totalorder %s31_s1, 4  }
0x1553   :  { %30 = sbr.rel (!%p28_p6) target bundleno = 14 (0xe), region = 205 }
0x155a   :  { %3140 = vsyncpa [#allocation3], 1 }
0x155b   :  { %3142 = vsyncpa [#allocation3 + $0x1], 1 }

</bundles_post_ra>
